<compile_context>
chip_gen: v7x
topology: tpu7x:2x2x1
jax: 0.10.0
libtpu: 0.0.40
codegen_flags: <defaults>
</compile_context>

<pallas_src>
import numpy as np
import jax
import jax.numpy as jnp
from jax import lax
from jax.experimental import pallas as pl
from jax.experimental.pallas import tpu as pltpu

NUM_ACTIONS = 16      # len(actions) in the PyTorch script
INPUT_SIZE = 198
HIDDEN = 128
K_PAD = 256           # input feature axis padded 198 -> 256 (lane aligned)
OUT_PAD = 128         # fc output padded 16 -> 128 (lane-dense stores)


def _round_up(n, m):
    return (n + m - 1) // m * m


# ----------------------------------------------------------------------------
# Pallas kernel: whole forward pass fused, one batch tile per grid step
# ----------------------------------------------------------------------------
def detection_kernel(x_ref,
                     w1_ref, b1_ref,
                     w2ab_ref, b2ab_ref,
                     gamma_ref, beta_ref,
                     wx_fb_ref, whf_ref, bf_ref, bb_ref,
                     wfc_f_ref, wfc_b_ref, bfc_ref,
                     out_ref):
    TB = x_ref.shape[0]
    H = HIDDEN

    x = x_ref[...]                                    # (TB, 256) zero-padded feats

    # --- conv1 (k=3, pad=1, L=1): only the middle tap sees non-zero input ---
    h = jnp.dot(x, w1_ref[...], preferred_element_type=jnp.float32) + b1_ref[...]
    h = jnp.maximum(h, 0.0)                           # relu -> (TB, 64)

    # --- pool1 (k=2, s=1, -inf pad): length 1 -> 2, both positions == h ------
    # --- conv2 (k=3, pad=1) on [h, h], taps pre-folded in the wrapper: -------
    #       a = h @ (W2[:,:,1]+W2[:,:,2]).T + b2   (position 0)
    #       b = h @ (W2[:,:,0]+W2[:,:,1]).T + b2   (position 1)
    ab = jnp.dot(h, w2ab_ref[...], preferred_element_type=jnp.float32) + b2ab_ref[...]
    ab = jnp.maximum(ab, 0.0)                         # (TB, 256) = [a | b]
    a = ab[:, 0:H]
    b = ab[:, H:2 * H]

    # --- pool2: length 2 -> 3 : [a, max(a,b), b] ------------------------------
    p0 = a
    p1 = jnp.maximum(a, b)
    p2 = b

    # --- LayerNorm over (128 channels x 3 positions) per batch row (f32) ------
    n_elem = 3.0 * H
    mean = jnp.sum(p0 + p1 + p2, axis=-1, keepdims=True) / n_elem
    var = jnp.sum((p0 - mean) ** 2 + (p1 - mean) ** 2 + (p2 - mean) ** 2,
                  axis=-1, keepdims=True) / n_elem
    inv = lax.rsqrt(var + 1e-5)
    g = gamma_ref[...]                                # (3, 128)
    bt = beta_ref[...]                                # (3, 128)
    y0 = (p0 - mean) * inv * g[0:1, :] + bt[0:1, :]
    y1 = (p1 - mean) * inv * g[1:2, :] + bt[1:2, :]
    y2 = (p2 - mean) * inv * g[2:3, :] + bt[2:3, :]
    # TODO(synk): nn.Dropout(p=0.3) is identity in inference mode; train-mode RNG drop not implemented.

    # --- biLSTM: all x-side matmuls hoisted into one slab matmul --------------
    # y_slab (3*TB,128) @ [W_ih_fwd | W_ih_bwd] (128,1024); only h@W_hh stays
    # on the serial recurrent path.
    y_slab = jnp.concatenate([y0, y1, y2], axis=0)    # (3*TB, 128)
    gx_all = jnp.dot(y_slab, wx_fb_ref[...], preferred_element_type=jnp.float32)
    gx0 = gx_all[0 * TB:1 * TB, 0:4 * H]
    gx1 = gx_all[1 * TB:2 * TB, 0:4 * H]
    gx2 = gx_all[2 * TB:3 * TB, 0:4 * H]
    gbx = gx_all[2 * TB:3 * TB, 4 * H:8 * H]          # backward x-gates for y2

    whf = whf_ref[...]                                # (128, 512)
    bf = bf_ref[...]                                  # (1, 512)

    # forward step 0 (h = c = 0): no recurrent matmul, no f*c term.
    gg = gx0 + bf
    i_g = jax.nn.sigmoid(gg[:, 0:H])
    g_g = jnp.tanh(gg[:, 2 * H:3 * H])
    o_g = jax.nn.sigmoid(gg[:, 3 * H:4 * H])
    cf = i_g * g_g
    hf = o_g * jnp.tanh(cf)

    # forward steps 1, 2 (full recurrence).
    for gx_t in (gx1, gx2):
        gg = gx_t + jnp.dot(hf, whf, preferred_element_type=jnp.float32) + bf
        i_g = jax.nn.sigmoid(gg[:, 0:H])
        f_g = jax.nn.sigmoid(gg[:, H:2 * H])
        g_g = jnp.tanh(gg[:, 2 * H:3 * H])
        o_g = jax.nn.sigmoid(gg[:, 3 * H:4 * H])
        cf = f_g * cf + i_g * g_g
        hf = o_g * jnp.tanh(cf)

    # reverse direction, last-timestep output == one step on y2 from zero state.
    gb = gbx + bb_ref[...]
    i_b = jax.nn.sigmoid(gb[:, 0:H])
    g_b = jnp.tanh(gb[:, 2 * H:3 * H])
    o_b = jax.nn.sigmoid(gb[:, 3 * H:4 * H])
    cb = i_b * g_b
    hb = o_b * jnp.tanh(cb)

    # --- fc + sigmoid: no lane-axis concat, two K=128 matmuls into one acc ----
    logits = (jnp.dot(hf, wfc_f_ref[...], preferred_element_type=jnp.float32)
              + jnp.dot(hb, wfc_b_ref[...], preferred_element_type=jnp.float32)
              + bfc_ref[...])
    out_ref[...] = jax.nn.sigmoid(logits)             # (TB, 128); cols 16.. are pad


# ----------------------------------------------------------------------------
# One-time parameter preprocessing (transposes / tap folds / bias combines)
# ----------------------------------------------------------------------------
def preprocess_params(params):
    (W1, b1, W2, b2, gamma, beta,
     w_ih_f, w_hh_f, b_ih_f, b_hh_f,
     w_ih_b, w_hh_b, b_ih_b, b_hh_b,
     Wfc, bfc) = params

    # conv1 center tap, K padded 198 -> 256.
    w1 = jnp.zeros((K_PAD, 64), jnp.float32).at[:INPUT_SIZE, :].set(W1[:, :, 1].T)
    b1p = b1[None, :]                                              # (1, 64)

    # conv2 folded taps, concatenated on the output (lane) axis.
    Wa = (W2[:, :, 1] + W2[:, :, 2]).T                             # (64, 128)
    Wb = (W2[:, :, 0] + W2[:, :, 1]).T                             # (64, 128)
    w2ab = jnp.concatenate([Wa, Wb], axis=1)                       # (64, 256)
    b2ab = jnp.concatenate([b2, b2])[None, :]                      # (1, 256)

    gam = gamma.T                                                  # (3, 128)
    bet = beta.T                                                   # (3, 128)

    wx_fb = jnp.concatenate([w_ih_f.T, w_ih_b.T], axis=1)          # (128, 1024)
    whf = w_hh_f.T                                                 # (128, 512)
    bf = (b_ih_f + b_hh_f)[None, :]                                # (1, 512)
    bb = (b_ih_b + b_hh_b)[None, :]                                # (1, 512)

    # fc split (forward / backward halves) + pad N 16 -> 128.
    wfc_t = Wfc.T                                                  # (256, 16)
    wfc_f = jnp.zeros((HIDDEN, OUT_PAD), jnp.float32).at[:, :NUM_ACTIONS].set(wfc_t[:HIDDEN])
    wfc_b = jnp.zeros((HIDDEN, OUT_PAD), jnp.float32).at[:, :NUM_ACTIONS].set(wfc_t[HIDDEN:])
    bfc_p = jnp.zeros((1, OUT_PAD), jnp.float32).at[0, :NUM_ACTIONS].set(bfc)

    return (w1, b1p, w2ab, b2ab, gam, bet, wx_fb, whf, bf, bb, wfc_f, wfc_b, bfc_p)


# ----------------------------------------------------------------------------
# Wrapper: batch-tiled grid, parallel semantics, lane-aligned padding
# ----------------------------------------------------------------------------
def detection_model_pallas(x, prep):
    B = x.shape[0]
    TB = min(256, _round_up(max(B, 1), 8))            # MXU-sized batch tile
    B_pad = _round_up(B, TB)
    x_p = jnp.zeros((B_pad, K_PAD), jnp.float32).at[:B, :INPUT_SIZE].set(x)

    in_specs = [pl.BlockSpec((TB, K_PAD), lambda i: (i, 0))]
    in_specs += [pl.BlockSpec(w.shape, lambda i: (0, 0)) for w in prep]

    out = pl.pallas_call(
        detection_kernel,
        out_shape=jax.ShapeDtypeStruct((B_pad, OUT_PAD), jnp.float32),
        grid=(B_pad // TB,),
        in_specs=in_specs,
        out_specs=pl.BlockSpec((TB, OUT_PAD), lambda i: (i, 0)),
        compiler_params=pltpu.CompilerParams(dimension_semantics=("parallel",)),
    )(x_p, *prep)
    return out[:B, :NUM_ACTIONS]


# ----------------------------------------------------------------------------
# Pure-JAX reference (general conv/pool/LSTM, mirrors the PyTorch module)
# ----------------------------------------------------------------------------
def detection_model_ref(x, params):
    (W1, b1, W2, b2, gamma, beta,
     w_ih_f, w_hh_f, b_ih_f, b_hh_f,
     w_ih_b, w_hh_b, b_ih_b, b_hh_b,
     Wfc, bfc) = params

    z = x[:, None, :]                        # unsqueeze(1) -> (B, 1, 198)
    z = jnp.transpose(z, (0, 2, 1))          # transpose(1,2) -> (B, 198, 1)

    def conv1d(v, W, bb):                    # pad=1, k=3, NCL layout
        L = v.shape[2]
        vp = jnp.pad(v, ((0, 0), (0, 0), (1, 1)))
        out = jnp.broadcast_to(bb[None, :, None], (v.shape[0], W.shape[0], L)).astype(jnp.float32)
        for k in range(3):
            out = out + jnp.einsum('bcl,oc->bol', vp[:, :, k:k + L], W[:, :, k])
        return out

    def maxpool(v):                          # k=2, s=1, pad=1 (-inf padding)
        vp = jnp.pad(v, ((0, 0), (0, 0), (1, 1)), constant_values=-jnp.inf)
        return jnp.maximum(vp[:, :, :-1], vp[:, :, 1:])

    z = maxpool(jax.nn.relu(conv1d(z, W1, b1)))
    z = maxpool(jax.nn.relu(conv1d(z, W2, b2)))

    mean = jnp.mean(z, axis=(1, 2), keepdims=True)
    var = jnp.mean((z - mean) ** 2, axis=(1, 2), keepdims=True)
    z = (z - mean) / jnp.sqrt(var + 1e-5) * gamma[None] + beta[None]

    z = jnp.transpose(z, (0, 2, 1))          # (B, 3, 128)

    def lstm_dir(seq, w_ih, w_hh, bi, bh):
        Bb, T, _ = seq.shape
        h = jnp.zeros((Bb, HIDDEN), jnp.float32)
        c = jnp.zeros((Bb, HIDDEN), jnp.float32)
        outs = []
        for t in range(T):
            g = seq[:, t, :] @ w_ih.T + bi + h @ w_hh.T + bh
            i_g = jax.nn.sigmoid(g[:, :HIDDEN])
            f_g = jax.nn.sigmoid(g[:, HIDDEN:2 * HIDDEN])
            g_g = jnp.tanh(g[:, 2 * HIDDEN:3 * HIDDEN])
            o_g = jax.nn.sigmoid(g[:, 3 * HIDDEN:])
            c = f_g * c + i_g * g_g
            h = o_g * jnp.tanh(c)
            outs.append(h)
        return jnp.stack(outs, axis=1)

    out_f = lstm_dir(z, w_ih_f, w_hh_f, b_ih_f, b_hh_f)
    out_b = lstm_dir(z[:, ::-1, :], w_ih_b, w_hh_b, b_ih_b, b_hh_b)[:, ::-1, :]
    last = jnp.concatenate([out_f, out_b], axis=-1)[:, -1, :]
    return jax.nn.sigmoid(last @ Wfc.T + bfc)


# ----------------------------------------------------------------------------
# Deterministic parameter init (PyTorch-like uniform(-1/sqrt(fan_in), ...))
# ----------------------------------------------------------------------------
def init_params(key):
    ks = jax.random.split(key, 16)

    def unif(k, shape, fan_in):
        bound = 1.0 / np.sqrt(fan_in)
        return jax.random.uniform(k, shape, jnp.float32, -bound, bound)

    W1 = unif(ks[0], (64, INPUT_SIZE, 3), INPUT_SIZE * 3)
    b1 = unif(ks[1], (64,), INPUT_SIZE * 3)
    W2 = unif(ks[2], (128, 64, 3), 64 * 3)
    b2 = unif(ks[3], (128,), 64 * 3)
    gamma = jnp.ones((HIDDEN, 3), jnp.float32)
    beta = jnp.zeros((HIDDEN, 3), jnp.float32)
    w_ih_f = unif(ks[4], (4 * HIDDEN, HIDDEN), HIDDEN)
    w_hh_f = unif(ks[5], (4 * HIDDEN, HIDDEN), HIDDEN)
    b_ih_f = unif(ks[6], (4 * HIDDEN,), HIDDEN)
    b_hh_f = unif(ks[7], (4 * HIDDEN,), HIDDEN)
    w_ih_b = unif(ks[8], (4 * HIDDEN, HIDDEN), HIDDEN)
    w_hh_b = unif(ks[9], (4 * HIDDEN, HIDDEN), HIDDEN)
    b_ih_b = unif(ks[10], (4 * HIDDEN,), HIDDEN)
    b_hh_b = unif(ks[11], (4 * HIDDEN,), HIDDEN)
    Wfc = unif(ks[12], (NUM_ACTIONS, 2 * HIDDEN), 2 * HIDDEN)
    bfc = unif(ks[13], (NUM_ACTIONS,), 2 * HIDDEN)
    return (W1, b1, W2, b2, gamma, beta,
            w_ih_f, w_hh_f, b_ih_f, b_hh_f,
            w_ih_b, w_hh_b, b_ih_b, b_hh_b,
            Wfc, bfc)


if __name__ == "__main__":
    key = jax.random.PRNGKey(0)
    k_x, k_p = jax.random.split(key)
    B = 8
    x = jax.random.normal(k_x, (B, INPUT_SIZE), jnp.float32)   # 2-D input path of forward()
    params = init_params(k_p)

    prep = preprocess_params(params)          # one-time parameter preprocessing
    fwd = jax.jit(detection_model_pallas)

    out = jax.block_until_ready(fwd(x, prep))

    ref = jax.block_until_ready(detection_model_ref(x, params))
    np.testing.assert_allclose(np.asarray(out), np.asarray(ref), rtol=2e-3, atol=2e-3)
    assert out.shape == (B, NUM_ACTIONS)

    print("KERNEL_OK")
</pallas_src>

<mosaic_0001>
module attributes {stable_mosaic.version = 11 : i64} {
  func.func @detection_kernel(%arg0: i32, %arg1: memref<8x256xf32, #tpu.memory_space<vmem>>, %arg2: memref<256x64xf32, #tpu.memory_space<vmem>>, %arg3: memref<1x64xf32, #tpu.memory_space<vmem>>, %arg4: memref<64x256xf32, #tpu.memory_space<vmem>>, %arg5: memref<1x256xf32, #tpu.memory_space<vmem>>, %arg6: memref<3x128xf32, #tpu.memory_space<vmem>>, %arg7: memref<3x128xf32, #tpu.memory_space<vmem>>, %arg8: memref<128x1024xf32, #tpu.memory_space<vmem>>, %arg9: memref<128x512xf32, #tpu.memory_space<vmem>>, %arg10: memref<1x512xf32, #tpu.memory_space<vmem>>, %arg11: memref<1x512xf32, #tpu.memory_space<vmem>>, %arg12: memref<128x128xf32, #tpu.memory_space<vmem>>, %arg13: memref<128x128xf32, #tpu.memory_space<vmem>>, %arg14: memref<1x128xf32, #tpu.memory_space<vmem>>, %arg15: memref<8x128xf32, #tpu.memory_space<vmem>>) attributes {dimension_semantics = [#tpu.dimension_semantics<parallel>], iteration_bounds = array<i64: 1>, scalar_prefetch = 0 : i64, scratch_operands = 0 : i64, tpu.core_type = #tpu.core_type<tc>, window_params = [{transform_indices = @transform_0, window_bounds = array<i64: 8, 256>}, {pipeline_mode = #tpu.pipeline_mode<synchronous>, transform_indices = @transform_1, window_bounds = array<i64: 256, 64>}, {pipeline_mode = #tpu.pipeline_mode<synchronous>, transform_indices = @transform_2, window_bounds = array<i64: 1, 64>}, {pipeline_mode = #tpu.pipeline_mode<synchronous>, transform_indices = @transform_3, window_bounds = array<i64: 64, 256>}, {pipeline_mode = #tpu.pipeline_mode<synchronous>, transform_indices = @transform_4, window_bounds = array<i64: 1, 256>}, {pipeline_mode = #tpu.pipeline_mode<synchronous>, transform_indices = @transform_5, window_bounds = array<i64: 3, 128>}, {pipeline_mode = #tpu.pipeline_mode<synchronous>, transform_indices = @transform_6, window_bounds = array<i64: 3, 128>}, {pipeline_mode = #tpu.pipeline_mode<synchronous>, transform_indices = @transform_7, window_bounds = array<i64: 128, 1024>}, {pipeline_mode = #tpu.pipeline_mode<synchronous>, transform_indices = @transform_8, window_bounds = array<i64: 128, 512>}, {pipeline_mode = #tpu.pipeline_mode<synchronous>, transform_indices = @transform_9, window_bounds = array<i64: 1, 512>}, {pipeline_mode = #tpu.pipeline_mode<synchronous>, transform_indices = @transform_10, window_bounds = array<i64: 1, 512>}, {pipeline_mode = #tpu.pipeline_mode<synchronous>, transform_indices = @transform_11, window_bounds = array<i64: 128, 128>}, {pipeline_mode = #tpu.pipeline_mode<synchronous>, transform_indices = @transform_12, window_bounds = array<i64: 128, 128>}, {pipeline_mode = #tpu.pipeline_mode<synchronous>, transform_indices = @transform_13, window_bounds = array<i64: 1, 128>}, {transform_indices = @transform_14, window_bounds = array<i64: 8, 128>}]} {
    %c0 = arith.constant 0 : index
    %c0_0 = arith.constant 0 : index
    %0 = vector.load %arg1[%c0, %c0_0] : memref<8x256xf32, #tpu.memory_space<vmem>>, vector<8x256xf32>
    %c0_1 = arith.constant 0 : index
    %c0_2 = arith.constant 0 : index
    %1 = vector.load %arg2[%c0_1, %c0_2] : memref<256x64xf32, #tpu.memory_space<vmem>>, vector<256x64xf32>
    %cst = arith.constant dense<0.000000e+00> : vector<8x64xf32>
    %2 = tpu.matmul %0, %1, %cst {dimension_numbers = #tpu.dot_dimension_numbers<[1], [0], [0], [1], [0, 0, 1, 1], [], []>} : vector<8x256xf32>, vector<256x64xf32>, vector<8x64xf32> -> vector<8x64xf32>
    %c0_3 = arith.constant 0 : index
    %c0_4 = arith.constant 0 : index
    %3 = vector.load %arg3[%c0_3, %c0_4] : memref<1x64xf32, #tpu.memory_space<vmem>>, vector<1x64xf32>
    %4 = vector.broadcast %3 : vector<1x64xf32> to vector<8x64xf32>
    %5 = arith.addf %2, %4 : vector<8x64xf32>
    %cst_5 = arith.constant 0.000000e+00 : f32
    %6 = vector.broadcast %cst_5 : f32 to vector<8x64xf32>
    %7 = arith.maximumf %5, %6 : vector<8x64xf32>
    %c0_6 = arith.constant 0 : index
    %c0_7 = arith.constant 0 : index
    %8 = vector.load %arg4[%c0_6, %c0_7] : memref<64x256xf32, #tpu.memory_space<vmem>>, vector<64x256xf32>
    %cst_8 = arith.constant dense<0.000000e+00> : vector<8x256xf32>
    %9 = tpu.matmul %7, %8, %cst_8 {dimension_numbers = #tpu.dot_dimension_numbers<[1], [0], [0], [1], [0, 0, 1, 1], [], []>} : vector<8x64xf32>, vector<64x256xf32>, vector<8x256xf32> -> vector<8x256xf32>
    %c0_9 = arith.constant 0 : index
    %c0_10 = arith.constant 0 : index
    %10 = vector.load %arg5[%c0_9, %c0_10] : memref<1x256xf32, #tpu.memory_space<vmem>>, vector<1x256xf32>
    %11 = vector.broadcast %10 : vector<1x256xf32> to vector<8x256xf32>
    %12 = arith.addf %9, %11 : vector<8x256xf32>
    %cst_11 = arith.constant 0.000000e+00 : f32
    %13 = vector.broadcast %cst_11 : f32 to vector<8x256xf32>
    %14 = arith.maximumf %12, %13 : vector<8x256xf32>
    %15 = vector.extract_strided_slice %14 {offsets = [0, 0], sizes = [8, 128], strides = [1, 1]} : vector<8x256xf32> to vector<8x128xf32>
    %16 = vector.extract_strided_slice %14 {offsets = [0, 128], sizes = [8, 128], strides = [1, 1]} : vector<8x256xf32> to vector<8x128xf32>
    %17 = arith.maximumf %15, %16 : vector<8x128xf32>
    %18 = arith.addf %15, %17 : vector<8x128xf32>
    %19 = arith.addf %18, %16 : vector<8x128xf32>
    %cst_12 = arith.constant dense<0.000000e+00> : vector<8xf32>
    %20 = vector.multi_reduction <add>, %19, %cst_12 [1] : vector<8x128xf32> to vector<8xf32>
    %21 = vector.shape_cast %20 : vector<8xf32> to vector<8x1xf32>
    %cst_13 = arith.constant 3.840000e+02 : f32
    %22 = vector.broadcast %cst_13 : f32 to vector<8x1xf32>
    %23 = arith.divf %21, %22 : vector<8x1xf32>
    %24 = vector.broadcast %23 : vector<8x1xf32> to vector<8x128xf32>
    %25 = arith.subf %15, %24 : vector<8x128xf32>
    %26 = arith.mulf %25, %25 : vector<8x128xf32>
    %27 = vector.broadcast %23 : vector<8x1xf32> to vector<8x128xf32>
    %28 = arith.subf %17, %27 : vector<8x128xf32>
    %29 = arith.mulf %28, %28 : vector<8x128xf32>
    %30 = arith.addf %26, %29 : vector<8x128xf32>
    %31 = vector.broadcast %23 : vector<8x1xf32> to vector<8x128xf32>
    %32 = arith.subf %16, %31 : vector<8x128xf32>
    %33 = arith.mulf %32, %32 : vector<8x128xf32>
    %34 = arith.addf %30, %33 : vector<8x128xf32>
    %cst_14 = arith.constant dense<0.000000e+00> : vector<8xf32>
    %35 = vector.multi_reduction <add>, %34, %cst_14 [1] : vector<8x128xf32> to vector<8xf32>
    %36 = vector.shape_cast %35 : vector<8xf32> to vector<8x1xf32>
    %cst_15 = arith.constant 3.840000e+02 : f32
    %37 = vector.broadcast %cst_15 : f32 to vector<8x1xf32>
    %38 = arith.divf %36, %37 : vector<8x1xf32>
    %cst_16 = arith.constant 9.99999974E-6 : f32
    %39 = vector.broadcast %cst_16 : f32 to vector<8x1xf32>
    %40 = arith.addf %38, %39 : vector<8x1xf32>
    %41 = math.rsqrt %40 : vector<8x1xf32>
    %c0_17 = arith.constant 0 : index
    %c0_18 = arith.constant 0 : index
    %42 = vector.load %arg6[%c0_17, %c0_18] : memref<3x128xf32, #tpu.memory_space<vmem>>, vector<3x128xf32>
    %c0_19 = arith.constant 0 : index
    %c0_20 = arith.constant 0 : index
    %43 = vector.load %arg7[%c0_19, %c0_20] : memref<3x128xf32, #tpu.memory_space<vmem>>, vector<3x128xf32>
    %44 = vector.broadcast %23 : vector<8x1xf32> to vector<8x128xf32>
    %45 = arith.subf %15, %44 : vector<8x128xf32>
    %46 = vector.broadcast %41 : vector<8x1xf32> to vector<8x128xf32>
    %47 = arith.mulf %45, %46 : vector<8x128xf32>
    %48 = vector.extract_strided_slice %42 {offsets = [0, 0], sizes = [1, 128], strides = [1, 1]} : vector<3x128xf32> to vector<1x128xf32>
    %49 = vector.broadcast %48 : vector<1x128xf32> to vector<8x128xf32>
    %50 = arith.mulf %47, %49 : vector<8x128xf32>
    %51 = vector.extract_strided_slice %43 {offsets = [0, 0], sizes = [1, 128], strides = [1, 1]} : vector<3x128xf32> to vector<1x128xf32>
    %52 = vector.broadcast %51 : vector<1x128xf32> to vector<8x128xf32>
    %53 = arith.addf %50, %52 : vector<8x128xf32>
    %54 = vector.broadcast %23 : vector<8x1xf32> to vector<8x128xf32>
    %55 = arith.subf %17, %54 : vector<8x128xf32>
    %56 = vector.broadcast %41 : vector<8x1xf32> to vector<8x128xf32>
    %57 = arith.mulf %55, %56 : vector<8x128xf32>
    %58 = vector.extract_strided_slice %42 {offsets = [1, 0], sizes = [1, 128], strides = [1, 1]} : vector<3x128xf32> to vector<1x128xf32>
    %59 = vector.broadcast %58 : vector<1x128xf32> to vector<8x128xf32>
    %60 = arith.mulf %57, %59 : vector<8x128xf32>
    %61 = vector.extract_strided_slice %43 {offsets = [1, 0], sizes = [1, 128], strides = [1, 1]} : vector<3x128xf32> to vector<1x128xf32>
    %62 = vector.broadcast %61 : vector<1x128xf32> to vector<8x128xf32>
    %63 = arith.addf %60, %62 : vector<8x128xf32>
    %64 = vector.broadcast %23 : vector<8x1xf32> to vector<8x128xf32>
    %65 = arith.subf %16, %64 : vector<8x128xf32>
    %66 = vector.broadcast %41 : vector<8x1xf32> to vector<8x128xf32>
    %67 = arith.mulf %65, %66 : vector<8x128xf32>
    %68 = vector.extract_strided_slice %42 {offsets = [2, 0], sizes = [1, 128], strides = [1, 1]} : vector<3x128xf32> to vector<1x128xf32>
    %69 = vector.broadcast %68 : vector<1x128xf32> to vector<8x128xf32>
    %70 = arith.mulf %67, %69 : vector<8x128xf32>
    %71 = vector.extract_strided_slice %43 {offsets = [2, 0], sizes = [1, 128], strides = [1, 1]} : vector<3x128xf32> to vector<1x128xf32>
    %72 = vector.broadcast %71 : vector<1x128xf32> to vector<8x128xf32>
    %73 = arith.addf %70, %72 : vector<8x128xf32>
    %74 = tpu.concatenate %53, %63, %73 in 0 : vector<8x128xf32>, vector<8x128xf32>, vector<8x128xf32> -> vector<24x128xf32>
    %c0_21 = arith.constant 0 : index
    %c0_22 = arith.constant 0 : index
    %75 = vector.load %arg8[%c0_21, %c0_22] : memref<128x1024xf32, #tpu.memory_space<vmem>>, vector<128x1024xf32>
    %cst_23 = arith.constant dense<0.000000e+00> : vector<24x1024xf32>
    %76 = tpu.matmul %74, %75, %cst_23 {dimension_numbers = #tpu.dot_dimension_numbers<[1], [0], [0], [1], [0, 0, 1, 1], [], []>} : vector<24x128xf32>, vector<128x1024xf32>, vector<24x1024xf32> -> vector<24x1024xf32>
    %77 = vector.extract_strided_slice %76 {offsets = [0, 0], sizes = [8, 512], strides = [1, 1]} : vector<24x1024xf32> to vector<8x512xf32>
    %78 = vector.extract_strided_slice %76 {offsets = [8, 0], sizes = [8, 512], strides = [1, 1]} : vector<24x1024xf32> to vector<8x512xf32>
    %79 = vector.extract_strided_slice %76 {offsets = [16, 0], sizes = [8, 512], strides = [1, 1]} : vector<24x1024xf32> to vector<8x512xf32>
    %80 = vector.extract_strided_slice %76 {offsets = [16, 512], sizes = [8, 512], strides = [1, 1]} : vector<24x1024xf32> to vector<8x512xf32>
    %c0_24 = arith.constant 0 : index
    %c0_25 = arith.constant 0 : index
    %81 = vector.load %arg9[%c0_24, %c0_25] : memref<128x512xf32, #tpu.memory_space<vmem>>, vector<128x512xf32>
    %c0_26 = arith.constant 0 : index
    %c0_27 = arith.constant 0 : index
    %82 = vector.load %arg10[%c0_26, %c0_27] : memref<1x512xf32, #tpu.memory_space<vmem>>, vector<1x512xf32>
    %83 = vector.broadcast %82 : vector<1x512xf32> to vector<8x512xf32>
    %84 = arith.addf %77, %83 : vector<8x512xf32>
    %85 = vector.extract_strided_slice %84 {offsets = [0, 0], sizes = [8, 128], strides = [1, 1]} : vector<8x512xf32> to vector<8x128xf32>
    %86 = arith.negf %85 : vector<8x128xf32>
    %87 = math.exp %86 : vector<8x128xf32>
    %cst_28 = arith.constant 1.000000e+00 : f32
    %88 = vector.broadcast %cst_28 : f32 to vector<8x128xf32>
    %89 = arith.addf %88, %87 : vector<8x128xf32>
    %90 = arith.divf %88, %89 : vector<8x128xf32>
    %91 = vector.extract_strided_slice %84 {offsets = [0, 256], sizes = [8, 128], strides = [1, 1]} : vector<8x512xf32> to vector<8x128xf32>
    %92 = math.tanh %91 : vector<8x128xf32>
    %93 = vector.extract_strided_slice %84 {offsets = [0, 384], sizes = [8, 128], strides = [1, 1]} : vector<8x512xf32> to vector<8x128xf32>
    %94 = arith.negf %93 : vector<8x128xf32>
    %95 = math.exp %94 : vector<8x128xf32>
    %cst_29 = arith.constant 1.000000e+00 : f32
    %96 = vector.broadcast %cst_29 : f32 to vector<8x128xf32>
    %97 = arith.addf %96, %95 : vector<8x128xf32>
    %98 = arith.divf %96, %97 : vector<8x128xf32>
    %99 = arith.mulf %90, %92 : vector<8x128xf32>
    %100 = math.tanh %99 : vector<8x128xf32>
    %101 = arith.mulf %98, %100 : vector<8x128xf32>
    %cst_30 = arith.constant dense<0.000000e+00> : vector<8x512xf32>
    %102 = tpu.matmul %101, %81, %cst_30 {dimension_numbers = #tpu.dot_dimension_numbers<[1], [0], [0], [1], [0, 0, 1, 1], [], []>} : vector<8x128xf32>, vector<128x512xf32>, vector<8x512xf32> -> vector<8x512xf32>
    %103 = arith.addf %78, %102 : vector<8x512xf32>
    %104 = vector.broadcast %82 : vector<1x512xf32> to vector<8x512xf32>
    %105 = arith.addf %103, %104 : vector<8x512xf32>
    %106 = vector.extract_strided_slice %105 {offsets = [0, 0], sizes = [8, 128], strides = [1, 1]} : vector<8x512xf32> to vector<8x128xf32>
    %107 = arith.negf %106 : vector<8x128xf32>
    %108 = math.exp %107 : vector<8x128xf32>
    %cst_31 = arith.constant 1.000000e+00 : f32
    %109 = vector.broadcast %cst_31 : f32 to vector<8x128xf32>
    %110 = arith.addf %109, %108 : vector<8x128xf32>
    %111 = arith.divf %109, %110 : vector<8x128xf32>
    %112 = vector.extract_strided_slice %105 {offsets = [0, 128], sizes = [8, 128], strides = [1, 1]} : vector<8x512xf32> to vector<8x128xf32>
    %113 = arith.negf %112 : vector<8x128xf32>
    %114 = math.exp %113 : vector<8x128xf32>
    %cst_32 = arith.constant 1.000000e+00 : f32
    %115 = vector.broadcast %cst_32 : f32 to vector<8x128xf32>
    %116 = arith.addf %115, %114 : vector<8x128xf32>
    %117 = arith.divf %115, %116 : vector<8x128xf32>
    %118 = vector.extract_strided_slice %105 {offsets = [0, 256], sizes = [8, 128], strides = [1, 1]} : vector<8x512xf32> to vector<8x128xf32>
    %119 = math.tanh %118 : vector<8x128xf32>
    %120 = vector.extract_strided_slice %105 {offsets = [0, 384], sizes = [8, 128], strides = [1, 1]} : vector<8x512xf32> to vector<8x128xf32>
    %121 = arith.negf %120 : vector<8x128xf32>
    %122 = math.exp %121 : vector<8x128xf32>
    %cst_33 = arith.constant 1.000000e+00 : f32
    %123 = vector.broadcast %cst_33 : f32 to vector<8x128xf32>
    %124 = arith.addf %123, %122 : vector<8x128xf32>
    %125 = arith.divf %123, %124 : vector<8x128xf32>
    %126 = arith.mulf %117, %99 : vector<8x128xf32>
    %127 = arith.mulf %111, %119 : vector<8x128xf32>
    %128 = arith.addf %126, %127 : vector<8x128xf32>
    %129 = math.tanh %128 : vector<8x128xf32>
    %130 = arith.mulf %125, %129 : vector<8x128xf32>
    %cst_34 = arith.constant dense<0.000000e+00> : vector<8x512xf32>
    %131 = tpu.matmul %130, %81, %cst_34 {dimension_numbers = #tpu.dot_dimension_numbers<[1], [0], [0], [1], [0, 0, 1, 1], [], []>} : vector<8x128xf32>, vector<128x512xf32>, vector<8x512xf32> -> vector<8x512xf32>
    %132 = arith.addf %79, %131 : vector<8x512xf32>
    %133 = vector.broadcast %82 : vector<1x512xf32> to vector<8x512xf32>
    %134 = arith.addf %132, %133 : vector<8x512xf32>
    %135 = vector.extract_strided_slice %134 {offsets = [0, 0], sizes = [8, 128], strides = [1, 1]} : vector<8x512xf32> to vector<8x128xf32>
    %136 = arith.negf %135 : vector<8x128xf32>
    %137 = math.exp %136 : vector<8x128xf32>
    %cst_35 = arith.constant 1.000000e+00 : f32
    %138 = vector.broadcast %cst_35 : f32 to vector<8x128xf32>
    %139 = arith.addf %138, %137 : vector<8x128xf32>
    %140 = arith.divf %138, %139 : vector<8x128xf32>
    %141 = vector.extract_strided_slice %134 {offsets = [0, 128], sizes = [8, 128], strides = [1, 1]} : vector<8x512xf32> to vector<8x128xf32>
    %142 = arith.negf %141 : vector<8x128xf32>
    %143 = math.exp %142 : vector<8x128xf32>
    %cst_36 = arith.constant 1.000000e+00 : f32
    %144 = vector.broadcast %cst_36 : f32 to vector<8x128xf32>
    %145 = arith.addf %144, %143 : vector<8x128xf32>
    %146 = arith.divf %144, %145 : vector<8x128xf32>
    %147 = vector.extract_strided_slice %134 {offsets = [0, 256], sizes = [8, 128], strides = [1, 1]} : vector<8x512xf32> to vector<8x128xf32>
    %148 = math.tanh %147 : vector<8x128xf32>
    %149 = vector.extract_strided_slice %134 {offsets = [0, 384], sizes = [8, 128], strides = [1, 1]} : vector<8x512xf32> to vector<8x128xf32>
    %150 = arith.negf %149 : vector<8x128xf32>
    %151 = math.exp %150 : vector<8x128xf32>
    %cst_37 = arith.constant 1.000000e+00 : f32
    %152 = vector.broadcast %cst_37 : f32 to vector<8x128xf32>
    %153 = arith.addf %152, %151 : vector<8x128xf32>
    %154 = arith.divf %152, %153 : vector<8x128xf32>
    %155 = arith.mulf %146, %128 : vector<8x128xf32>
    %156 = arith.mulf %140, %148 : vector<8x128xf32>
    %157 = arith.addf %155, %156 : vector<8x128xf32>
    %158 = math.tanh %157 : vector<8x128xf32>
    %159 = arith.mulf %154, %158 : vector<8x128xf32>
    %c0_38 = arith.constant 0 : index
    %c0_39 = arith.constant 0 : index
    %160 = vector.load %arg11[%c0_38, %c0_39] : memref<1x512xf32, #tpu.memory_space<vmem>>, vector<1x512xf32>
    %161 = vector.broadcast %160 : vector<1x512xf32> to vector<8x512xf32>
    %162 = arith.addf %80, %161 : vector<8x512xf32>
    %163 = vector.extract_strided_slice %162 {offsets = [0, 0], sizes = [8, 128], strides = [1, 1]} : vector<8x512xf32> to vector<8x128xf32>
    %164 = arith.negf %163 : vector<8x128xf32>
    %165 = math.exp %164 : vector<8x128xf32>
    %cst_40 = arith.constant 1.000000e+00 : f32
    %166 = vector.broadcast %cst_40 : f32 to vector<8x128xf32>
    %167 = arith.addf %166, %165 : vector<8x128xf32>
    %168 = arith.divf %166, %167 : vector<8x128xf32>
    %169 = vector.extract_strided_slice %162 {offsets = [0, 256], sizes = [8, 128], strides = [1, 1]} : vector<8x512xf32> to vector<8x128xf32>
    %170 = math.tanh %169 : vector<8x128xf32>
    %171 = vector.extract_strided_slice %162 {offsets = [0, 384], sizes = [8, 128], strides = [1, 1]} : vector<8x512xf32> to vector<8x128xf32>
    %172 = arith.negf %171 : vector<8x128xf32>
    %173 = math.exp %172 : vector<8x128xf32>
    %cst_41 = arith.constant 1.000000e+00 : f32
    %174 = vector.broadcast %cst_41 : f32 to vector<8x128xf32>
    %175 = arith.addf %174, %173 : vector<8x128xf32>
    %176 = arith.divf %174, %175 : vector<8x128xf32>
    %177 = arith.mulf %168, %170 : vector<8x128xf32>
    %178 = math.tanh %177 : vector<8x128xf32>
    %179 = arith.mulf %176, %178 : vector<8x128xf32>
    %c0_42 = arith.constant 0 : index
    %c0_43 = arith.constant 0 : index
    %180 = vector.load %arg12[%c0_42, %c0_43] : memref<128x128xf32, #tpu.memory_space<vmem>>, vector<128x128xf32>
    %cst_44 = arith.constant dense<0.000000e+00> : vector<8x128xf32>
    %181 = tpu.matmul %159, %180, %cst_44 {dimension_numbers = #tpu.dot_dimension_numbers<[1], [0], [0], [1], [0, 0, 1, 1], [], []>} : vector<8x128xf32>, vector<128x128xf32>, vector<8x128xf32> -> vector<8x128xf32>
    %c0_45 = arith.constant 0 : index
    %c0_46 = arith.constant 0 : index
    %182 = vector.load %arg13[%c0_45, %c0_46] : memref<128x128xf32, #tpu.memory_space<vmem>>, vector<128x128xf32>
    %cst_47 = arith.constant dense<0.000000e+00> : vector<8x128xf32>
    %183 = tpu.matmul %179, %182, %cst_47 {dimension_numbers = #tpu.dot_dimension_numbers<[1], [0], [0], [1], [0, 0, 1, 1], [], []>} : vector<8x128xf32>, vector<128x128xf32>, vector<8x128xf32> -> vector<8x128xf32>
    %184 = arith.addf %181, %183 : vector<8x128xf32>
    %c0_48 = arith.constant 0 : index
    %c0_49 = arith.constant 0 : index
    %185 = vector.load %arg14[%c0_48, %c0_49] : memref<1x128xf32, #tpu.memory_space<vmem>>, vector<1x128xf32>
    %186 = vector.broadcast %185 : vector<1x128xf32> to vector<8x128xf32>
    %187 = arith.addf %184, %186 : vector<8x128xf32>
    %188 = arith.negf %187 : vector<8x128xf32>
    %189 = math.exp %188 : vector<8x128xf32>
    %cst_50 = arith.constant 1.000000e+00 : f32
    %190 = vector.broadcast %cst_50 : f32 to vector<8x128xf32>
    %191 = arith.addf %190, %189 : vector<8x128xf32>
    %192 = arith.divf %190, %191 : vector<8x128xf32>
    %c0_51 = arith.constant 0 : index
    %c0_52 = arith.constant 0 : index
    %193 = vector.load %arg15[%c0_51, %c0_52] : memref<8x128xf32, #tpu.memory_space<vmem>>, vector<8x128xf32>
    tpu.vector_store %arg15[%c0_51, %c0_52], %192 {strides = array<i32>} : memref<8x128xf32, #tpu.memory_space<vmem>>, vector<8x128xf32>,
    return
  }
  func.func @transform_0(%arg0: i32) -> (i32, i32) {
    %c0_i32 = arith.constant 0 : i32
    %c0_i32_0 = arith.constant 0 : i32
    return %arg0, %c0_i32 : i32, i32
  }
  func.func @transform_1(%arg0: i32) -> (i32, i32) {
    %c0_i32 = arith.constant 0 : i32
    %c0_i32_0 = arith.constant 0 : i32
    %c0_i32_1 = arith.constant 0 : i32
    return %c0_i32, %c0_i32_0 : i32, i32
  }
  func.func @transform_2(%arg0: i32) -> (i32, i32) {
    %c0_i32 = arith.constant 0 : i32
    %c0_i32_0 = arith.constant 0 : i32
    %c0_i32_1 = arith.constant 0 : i32
    return %c0_i32, %c0_i32_0 : i32, i32
  }
  func.func @transform_3(%arg0: i32) -> (i32, i32) {
    %c0_i32 = arith.constant 0 : i32
    %c0_i32_0 = arith.constant 0 : i32
    %c0_i32_1 = arith.constant 0 : i32
    return %c0_i32, %c0_i32_0 : i32, i32
  }
  func.func @transform_4(%arg0: i32) -> (i32, i32) {
    %c0_i32 = arith.constant 0 : i32
    %c0_i32_0 = arith.constant 0 : i32
    %c0_i32_1 = arith.constant 0 : i32
    return %c0_i32, %c0_i32_0 : i32, i32
  }
  func.func @transform_5(%arg0: i32) -> (i32, i32) {
    %c0_i32 = arith.constant 0 : i32
    %c0_i32_0 = arith.constant 0 : i32
    %c0_i32_1 = arith.constant 0 : i32
    return %c0_i32, %c0_i32_0 : i32, i32
  }
  func.func @transform_6(%arg0: i32) -> (i32, i32) {
    %c0_i32 = arith.constant 0 : i32
    %c0_i32_0 = arith.constant 0 : i32
    %c0_i32_1 = arith.constant 0 : i32
    return %c0_i32, %c0_i32_0 : i32, i32
  }
  func.func @transform_7(%arg0: i32) -> (i32, i32) {
    %c0_i32 = arith.constant 0 : i32
    %c0_i32_0 = arith.constant 0 : i32
    %c0_i32_1 = arith.constant 0 : i32
    return %c0_i32, %c0_i32_0 : i32, i32
  }
  func.func @transform_8(%arg0: i32) -> (i32, i32) {
    %c0_i32 = arith.constant 0 : i32
    %c0_i32_0 = arith.constant 0 : i32
    %c0_i32_1 = arith.constant 0 : i32
    return %c0_i32, %c0_i32_0 : i32, i32
  }
  func.func @transform_9(%arg0: i32) -> (i32, i32) {
    %c0_i32 = arith.constant 0 : i32
    %c0_i32_0 = arith.constant 0 : i32
    %c0_i32_1 = arith.constant 0 : i32
    return %c0_i32, %c0_i32_0 : i32, i32
  }
  func.func @transform_10(%arg0: i32) -> (i32, i32) {
    %c0_i32 = arith.constant 0 : i32
    %c0_i32_0 = arith.constant 0 : i32
    %c0_i32_1 = arith.constant 0 : i32
    return %c0_i32, %c0_i32_0 : i32, i32
  }
  func.func @transform_11(%arg0: i32) -> (i32, i32) {
    %c0_i32 = arith.constant 0 : i32
    %c0_i32_0 = arith.constant 0 : i32
    %c0_i32_1 = arith.constant 0 : i32
    return %c0_i32, %c0_i32_0 : i32, i32
  }
  func.func @transform_12(%arg0: i32) -> (i32, i32) {
    %c0_i32 = arith.constant 0 : i32
    %c0_i32_0 = arith.constant 0 : i32
    %c0_i32_1 = arith.constant 0 : i32
    return %c0_i32, %c0_i32_0 : i32, i32
  }
  func.func @transform_13(%arg0: i32) -> (i32, i32) {
    %c0_i32 = arith.constant 0 : i32
    %c0_i32_0 = arith.constant 0 : i32
    %c0_i32_1 = arith.constant 0 : i32
    return %c0_i32, %c0_i32_0 : i32, i32
  }
  func.func @transform_14(%arg0: i32) -> (i32, i32) {
    %c0_i32 = arith.constant 0 : i32
    %c0_i32_0 = arith.constant 0 : i32
    return %arg0, %c0_i32 : i32, i32
  }
}

</mosaic_0001>

<bundles_post_ra>
// kernel: detection_model_pallas.1
= control target key start
LH: loop header
LB: loop body
LE: loop exit
PB: predicated region body
PF: predicated region fallthrough
CT: control target
= control target key end

     0   :  { %19 = vsyncpa [#allocation3], 0  ;;  %s2797_s0 = inlined_call_operand.vmem [shape: f32[8,256], index: 0, kind: input, shape index: {}]   ;;  %s2798_s1 = inlined_call_operand.vmem [shape: f32[256,64], index: 1, kind: input, shape index: {}]   ;;  %s2799_s2 = inlined_call_operand.vmem [shape: f32[1,64], index: 2, kind: input, shape index: {}]   ;;  %s2800_s3 = inlined_call_operand.vmem [shape: f32[64,256], index: 3, kind: input, shape index: {}]   ;;  %s2801_s4 = inlined_call_operand.vmem [shape: f32[1,256], index: 4, kind: input, shape index: {}]   ;;  %s2802_s5 = inlined_call_operand.vmem [shape: f32[3,128], index: 5, kind: input, shape index: {}]   ;;  %s2803_s6 = inlined_call_operand.vmem [shape: f32[3,128], index: 6, kind: input, shape index: {}]   ;;  %s2804_s7 = inlined_call_operand.hbm [shape: f32[128,1024], index: 7, kind: input, shape index: {}]   ;;  %s2805_s8 = inlined_call_operand.hbm [shape: f32[128,512], index: 8, kind: input, shape index: {}]   ;;  %s2806_s9 = inlined_call_operand.vmem [shape: f32[1,512], index: 9, kind: input, shape index: {}]   ;;  %s2807_s10 = inlined_call_operand.vmem [shape: f32[1,512], index: 10, kind: input, shape index: {}]   ;;  %s2808_s11 = inlined_call_operand.vmem [shape: f32[128,128], index: 11, kind: input, shape index: {}]   ;;  %s2809_s12 = inlined_call_operand.vmem [shape: f32[128,128], index: 12, kind: input, shape index: {}]   ;;  %s2810_s13 = inlined_call_operand.vmem [shape: f32[1,128], index: 13, kind: input, shape index: {}]   ;;  %s2811_s14 = inlined_call_operand.hbm [shape: f32[8,128], index: 14, kind: output, shape index: {}]  }
   0x1   :  { %20 = vsyncpa [#allocation6], 0 }
   0x2   :  { %21 = vsyncpa [#allocation4], 0  ;;  %s2147_s29 = smov [#allocation2]   ;;  %s2075_s17 = scalar_lea.hbm %s2804_s7, 16384 }
   0x3   :  { %s41_s30 = sshll.u32 %s2147_s29, 4  ;;  %p2076_p0 = scmp.ne.s32.totalorder %s2804_s7, %s2075_s17  ;;  %s42_s30 = int_to_ptr.vmem [resolvable:$true] %s41_s30 }
   0x4   :  { %p2079_p1 = scmp.lt.u32.totalorder %s2075_s17, %s2804_s7 }
   0x6   :  { %p2081_p2 = pnand %p2079_p1, %p2076_p0 }
   0x8   :  { %2084 = shalt.err (!%p2081_p2)
}
   0x9   :  { %s2085_s22 = scalar_lea.vmem %s42_s30, 16384  ;;  %p2090_p4 = scmp.lt.s32.totalorder %s42_s30, %s42_s30 }
   0xa   :  { %p2086_p3 = scmp.ne.s32.totalorder %s42_s30, %s2085_s22  ;;  %p2091_p5 = scmp.lt.s32.totalorder %s2085_s22, %s2085_s22 }
   0xc   :  { %p2092_p6 = por %p2091_p5, %p2090_p4 }
   0xe   :  { %p2093_p7 = pnand %p2092_p6, %p2086_p3 }
  0x10   :  { %2096 = shalt.err (!%p2093_p7)
}
  0x11   :  { %s2148_s23 = smov 1024   ;;  %s2149_s24 = smov 64  }
  0x12   :  { %47 = dma.hbm_to_vmem [thread:$0]  %s2804_s7, 16384, %s42_s30, [#allocation3], %s2148_s23, %s2148_s23, %s2149_s24  }
  0x13   :  { %s2150_s27 = smov [#allocation5]   ;;  %s2097_s16 = scalar_lea.hbm %s2805_s8, 8192 }
  0x14   :  { %s53_s28 = sshll.u32 %s2150_s27, 4  ;;  %p2098_p8 = scmp.ne.s32.totalorder %s2805_s8, %s2097_s16  ;;  %s54_s28 = int_to_ptr.vmem [resolvable:$true] %s53_s28 }
  0x15   :  { %p2101_p9 = scmp.lt.u32.totalorder %s2097_s16, %s2805_s8 }
  0x17   :  { %p2103_p10 = pnand %p2101_p9, %p2098_p8 }
  0x19   :  { %2106 = shalt.err (!%p2103_p10)
}
  0x1a   :  { %s2107_s21 = scalar_lea.vmem %s54_s28, 8192  ;;  %p2112_p12 = scmp.lt.s32.totalorder %s54_s28, %s54_s28 }
  0x1b   :  { %p2108_p11 = scmp.ne.s32.totalorder %s54_s28, %s2107_s21  ;;  %p2113_p13 = scmp.lt.s32.totalorder %s2107_s21, %s2107_s21 }
  0x1d   :  { %p2114_p0 = por %p2113_p13, %p2112_p12 }
  0x1f   :  { %p2115_p1 = pnand %p2114_p0, %p2108_p11 }
  0x21   :  { %2118 = shalt.err (!%p2115_p1)
}
  0x22   :  { %s2151_s7 = smov 512   ;;  %s2152_s30 = smov 32  }
  0x23   :  { %59 = dma.hbm_to_vmem [thread:$0]  %s2805_s8, 8192, %s54_s28, [#allocation6], %s2151_s7, %s2151_s7, %s2152_s30  }
  0x24   :  { %2141 = dma.done.wait [#allocation3], 16384  }
  0x25   :  { %2142 = vsyncadd [#allocation3], 4294950912 }
  0x26   :  { %2143 = dma.done.wait [#allocation6], 8192  }
  0x27   :  { %2144 = vsyncadd [#allocation6], 4294959104  ;;  %v94_v0 = vld [vmem:[%s2798_s1 + $0x80] sm:$0xff]  ;;  %v95_v1 = vld [vmem:[%s2798_s1 + $0x88] sm:$0xff]  ;;  %vm216_vm0 = vcmask 523264   ;;  %vm2155_vm1 = vmmov 0  }
  0x28   :  { %v78_v2 = vld [vmem:[%s2798_s1] sm:$0xff]  ;;  %v1643_v3 = vpack.c.bf16 %v95_v1, %v94_v0  ;;  %v79_v4 = vld [vmem:[%s2798_s1 + $0x8] sm:$0xff]  ;;  %v96_v5 = vld [vmem:[%s2798_s1 + $0x90] sm:$0xff]  ;;  %s2156_s26 = smov [#allocation7]  }
  0x29   :  { %v97_v6 = vld [vmem:[%s2798_s1 + $0x98] sm:$0xff]  ;;  %v1645_v7 = vpack.c.bf16 %v79_v4, %v78_v2  ;;  %v80_v9 = vld [vmem:[%s2798_s1 + $0x10] sm:$0xff]  ;;  %v98_v11 = vld [vmem:[%s2798_s1 + $0xa0] sm:$0xff]  ;;  %s1480_s27 = sshll.u32 %s2156_s26, 4  ;;  %s1481_s27 = int_to_ptr.vmem [resolvable:$true] %s1480_s27 }
  0x2a   :  { %v1647_v8 = vpack.c.bf16 %v97_v6, %v96_v5  ;;  %v81_v10 = vld [vmem:[%s2798_s1 + $0x18] sm:$0xff]  ;;  %1644 = vmatprep.subr.bf16.mxu0 %v1643_v3  ;;  %v99_v12 = vld [vmem:[%s2798_s1 + $0xa8] sm:$0xff]  ;;  %v82_v15 = vld [vmem:[%s2798_s1 + $0x20] sm:$0xff]  ;;  %s2119_s29 = scalar_lea.vmem %s1481_s27, 128  ;;  %p2124_p3 = scmp.lt.s32.totalorder %s1481_s27, %s1481_s27 }
  0x2b   :  { %1646 = vmatpush3.bf16.msra.mxu0 %v1645_v7  ;;  %v1649_v13 = vpack.c.bf16 %v81_v10, %v80_v9  ;;  %v1651_v14 = vpack.c.bf16 %v99_v12, %v98_v11  ;;  %v83_v16 = vld [vmem:[%s2798_s1 + $0x28] sm:$0xff]  ;;  %v100_v17 = vld [vmem:[%s2798_s1 + $0xb0] sm:$0xff]  ;;  %v101_v18 = vld [vmem:[%s2798_s1 + $0xb8] sm:$0xff]  ;;  %v2153_v10 = vmov 0.0   ;;  %p2120_p2 = scmp.ne.s32.totalorder %s1481_s27, %s2119_s29  ;;  %p2125_p4 = scmp.lt.s32.totalorder %s2119_s29, %s2119_s29 }
  0x2c   :  { %1648 = vmatprep.subr.bf16.mxu0 %v1647_v8  ;;  %v1653_v19 = vpack.c.bf16 %v83_v16, %v82_v15  ;;  %v1655_v20 = vpack.c.bf16 %v101_v18, %v100_v17  ;;  %v84_v21 = vld [vmem:[%s2798_s1 + $0x30] sm:$0xff]  ;;  %v85_v22 = vld [vmem:[%s2798_s1 + $0x38] sm:$0xff]  ;;  %v102_v23 = vld [vmem:[%s2798_s1 + $0xc0] sm:$0xff]  ;;  %284 = vmatprep.mubr.f32.mxu1 %v2153_v10  ;;  %v206_v17 = vlaneseq }
  0x2d   :  { %v103_v24 = vld [vmem:[%s2798_s1 + $0xc8] sm:$0xff]  ;;  %v86_v26 = vld [vmem:[%s2798_s1 + $0x40] sm:$0xff]  ;;  %v191_v29 = vld [vmem:[%s2800_s3 + $0x18] sm:$0xff]  ;;  %v1657_v30 = vpack.c.bf16 %v85_v22, %v84_v21  ;;  %p2126_p5 = por %p2125_p4, %p2124_p3 }
  0x2e   :  { %v77_v25 = vld [vmem:[%s2797_s0 + $0x8] sm:$0xff]  ;;  %v188_v32 = vld [vmem:[%s2800_s3] sm:$0xff]  ;;  %v190_v33 = vld [vmem:[%s2800_s3 + $0x10] sm:$0xff]  ;;  %v1659_v35 = vpack.c.bf16 %v103_v24, %v102_v23  ;;  %v2412_v18 = vshrl.u32 %v206_v17, 7 }
  0x2f   :  { %1650 = vmatpush3.bf16.msra.mxu0 %v1649_v13  ;;  %v87_v27 = vld [vmem:[%s2798_s1 + $0x48] sm:$0xff]  ;;  %181 = vmatprep.mubr.f32.mxu0 %v77_v25  ;;  %v1677_v36 = vpack.c.bf16 %v190_v33, %v188_v32  ;;  %v195_v37 = vld [vmem:[%s2800_s3 + $0x38] sm:$0xff]  ;;  %v192_v38 = vld [vmem:[%s2800_s3 + $0x20] sm:$0xff]  ;;  %p2127_p6 = pnand %p2126_p5, %p2120_p2 }
  0x30   :  { %1652 = vmatprep.subr.bf16.mxu0 %v1651_v14  ;;  %v189_v28 = vld [vmem:[%s2800_s3 + $0x8] sm:$0xff]  ;;  %v194_v39 = vld [vmem:[%s2800_s3 + $0x30] sm:$0xff]  ;;  %v105_v41 = vld [vmem:[%s2798_s1 + $0xd8] sm:$0xff]  ;;  %v1661_v44 = vpack.c.bf16 %v87_v27, %v86_v26  ;;  %v2421_v21 = vsub.s32 1, %v2412_v18 }
  0x31   :  { %v1675_v31 = vpack.c.bf16 %v191_v29, %v189_v28  ;;  %v193_v34 = vld [vmem:[%s2800_s3 + $0x28] sm:$0xff]  ;;  %v104_v40 = vld [vmem:[%s2798_s1 + $0xd0] sm:$0xff]  ;;  %v1681_v43 = vpack.c.bf16 %v194_v39, %v192_v38  ;;  %v89_v47 = vld [vmem:[%s2798_s1 + $0x58] sm:$0xff] }
  0x32   :  { %v1679_v42 = vpack.c.bf16 %v195_v37, %v193_v34  ;;  %v1663_v45 = vpack.c.bf16 %v105_v41, %v104_v40  ;;  %v88_v46 = vld [vmem:[%s2798_s1 + $0x50] sm:$0xff]  ;;  %v106_v48 = vld [vmem:[%s2798_s1 + $0xe0] sm:$0xff]  ;;  %v107_v49 = vld [vmem:[%s2798_s1 + $0xe8] sm:$0xff] }
  0x33   :  { %1654 = vmatpush3.bf16.msra.mxu0 %v1653_v19  ;;  %1676 = vmatprep.subr.bf16.mxu1 %v1675_v31  ;;  %v1665_v50 = vpack.c.bf16 %v89_v47, %v88_v46  ;;  %v1667_v51 = vpack.c.bf16 %v107_v49, %v106_v48  ;;  %v90_v52 = vld [vmem:[%s2798_s1 + $0x60] sm:$0xff]  ;;  %v91_v53 = vld [vmem:[%s2798_s1 + $0x68] sm:$0xff]  ;;  %v108_v54 = vld [vmem:[%s2798_s1 + $0xf0] sm:$0xff]  ;;  %v2415_v19 = vsub.s32 0, %v2412_v18 }
  0x34   :  { %1656 = vmatprep.subr.bf16.mxu0 %v1655_v20  ;;  %1678 = vmatpush1.bf16.msra.mxu1 %v1677_v36  ;;  %v109_v55 = vld [vmem:[%s2798_s1 + $0xf8] sm:$0xff]  ;;  %v1669_v56 = vpack.c.bf16 %v91_v53, %v90_v52  ;;  %v92_v58 = vld [vmem:[%s2798_s1 + $0x70] sm:$0xff]  ;;  %v76_v61 = vld [vmem:[%s2797_s0] sm:$0xff] }
  0x35   :  { %1680 = vmatprep.subr.bf16.mxu1 %v1679_v42  ;;  %v1671_v57 = vpack.c.bf16 %v109_v55, %v108_v54  ;;  %v93_v59 = vld [vmem:[%s2798_s1 + $0x78] sm:$0xff]  ;;  %v197_v62 = vld [vmem:[%s2800_s3 + $0x48] sm:$0xff]  ;;  %v196_v1 = vld [vmem:[%s2800_s3 + $0x40] sm:$0xff] }
  0x36   :  { %v1673_v60 = vpack.c.bf16 %v93_v59, %v92_v58  ;;  %v199_v63 = vld [vmem:[%s2800_s3 + $0x58] sm:$0xff]  ;;  %v198_v2 = vld [vmem:[%s2800_s3 + $0x50] sm:$0xff]  ;;  %v201_v4 = vld [vmem:[%s2800_s3 + $0x68] sm:$0xff] }
  0x37   :  { %1658 = vmatpush3.bf16.msra.mxu0 %v1657_v30  ;;  %v1683_v0 = vpack.c.bf16 %v199_v63, %v197_v62  ;;  %v1685_v3 = vpack.c.bf16 %v198_v2, %v196_v1  ;;  %v203_v5 = vld [vmem:[%s2800_s3 + $0x78] sm:$0xff]  ;;  %v200_v7 = vld [vmem:[%s2800_s3 + $0x60] sm:$0xff]  ;;  %v202_v8 = vld [vmem:[%s2800_s3 + $0x70] sm:$0xff] }
  0x38   :  { %1660 = vmatprep.subr.bf16.mxu0 %v1659_v35  ;;  %1682 = vmatpush1.bf16.msra.mxu1 %v1681_v43  ;;  %v1687_v6 = vpack.c.bf16 %v203_v5, %v201_v4  ;;  %v1689_v9 = vpack.c.bf16 %v202_v8, %v200_v7  ;;  %v1490_v12 = vld [vmem:[%s2799_s2] ss:$0 sm:$0xff]  ;;  %v349_v33 = vld [vmem:[#allocation2 + $0x8] sm:$0xff]  ;;  %v351_v35 = vld [vmem:[#allocation2 + $0x18] sm:$0xff] }
  0x39   :  { %1684 = vmatprep.subr.bf16.mxu1 %v1683_v0  ;;  %v204_v20 = vld [vmem:[%s2801_s4] sm:$0x3]  ;;  %v357_v34 = vld [vmem:[#allocation2 + $0x48] sm:$0xff]  ;;  %v359_v37 = vld [vmem:[#allocation2 + $0x58] sm:$0xff] }
  0x3a   :  { %v209_v22 = vrot.slane %v204_v20, %v2415_v19  ;;  %v213_v23 = vrot.slane %v204_v20, %v2421_v21  ;;  %v1691_v36 = vpack.c.bf16 %v357_v34, %v349_v33  ;;  %v348_v38 = vld [vmem:[#allocation2] sm:$0xff]  ;;  %v1723_v40 = vpack.c.bf16 %v359_v37, %v351_v35  ;;  %v350_v42 = vld [vmem:[#allocation2 + $0x10] sm:$0xff]  ;;  %v373_v46 = vld [vmem:[#allocation2 + $0xc8] sm:$0xff] }
  0x3b   :  { %1662 = vmatpush3.bf16.msra.mxu0 %v1661_v44  ;;  %v356_v39 = vld [vmem:[#allocation2 + $0x40] sm:$0xff]  ;;  %v358_v43 = vld [vmem:[#allocation2 + $0x50] sm:$0xff]  ;;  %v365_v44 = vld [vmem:[#allocation2 + $0x88] sm:$0xff] }
  0x3c   :  { %1664 = vmatprep.subr.bf16.mxu0 %v1663_v45  ;;  %1686 = vmatpush1.bf16.msra.mxu1 %v1685_v3  ;;  %v1693_v41 = vpack.c.bf16 %v356_v39, %v348_v38  ;;  %v1725_v45 = vpack.c.bf16 %v358_v43, %v350_v42  ;;  %v367_v47 = vld [vmem:[#allocation2 + $0x98] sm:$0xff]  ;;  %v1695_v49 = vpack.c.bf16 %v373_v46, %v365_v44  ;;  %v372_v52 = vld [vmem:[#allocation2 + $0xc0] sm:$0xff]  ;;  %v366_v53 = vld [vmem:[#allocation2 + $0x90] sm:$0xff] }
  0x3d   :  { %1688 = vmatprep.subr.bf16.mxu1 %v1687_v6  ;;  %v375_v48 = vld [vmem:[#allocation2 + $0xd8] sm:$0xff]  ;;  %v374_v55 = vld [vmem:[#allocation2 + $0xd0] sm:$0xff]  ;;  %v380_v62 = vld [vmem:[#allocation2 + $0x100] sm:$0xff] }
  0x3e   :  { %v1729_v58 = vpack.c.bf16 %v374_v55, %v366_v53  ;;  %v388_v0 = vld [vmem:[#allocation2 + $0x140] sm:$0xff]  ;;  %v382_v1 = vld [vmem:[#allocation2 + $0x110] sm:$0xff]  ;;  %v405_v17 = vld [vmem:[#allocation2 + $0x1c8] sm:$0xff] }
  0x3f   :  { %1666 = vmatpush3.bf16.msra.mxu0 %v1665_v50  ;;  %v1727_v50 = vpack.c.bf16 %v375_v48, %v367_v47  ;;  %v390_v2 = vld [vmem:[#allocation2 + $0x150] sm:$0xff]  ;;  %v1701_v3 = vpack.c.bf16 %v388_v0, %v380_v62  ;;  %v399_v20 = vld [vmem:[#allocation2 + $0x198] sm:$0xff]  ;;  %v420_v37 = vld [vmem:[#allocation2 + $0x240] sm:$0xff] }
  0x40   :  { %1668 = vmatprep.subr.bf16.mxu0 %v1667_v51  ;;  %1690 = vmatpush1.bf16.msra.mxu1 %v1689_v9  ;;  %v364_v51 = vld [vmem:[#allocation2 + $0x80] sm:$0xff]  ;;  %v1733_v4 = vpack.c.bf16 %v390_v2, %v382_v1  ;;  %v415_v33 = vld [vmem:[#allocation2 + $0x218] sm:$0xff]  ;;  %v429_v43 = vld [vmem:[#allocation2 + $0x288] sm:$0xff] }
  0x41   :  { %1692 = vmatprep.subr.bf16.mxu1 %v1691_v36  ;;  %v1697_v54 = vpack.c.bf16 %v372_v52, %v364_v51  ;;  %v423_v35 = vld [vmem:[#allocation2 + $0x258] sm:$0xff]  ;;  %v412_v36 = vld [vmem:[#allocation2 + $0x200] sm:$0xff]  ;;  %v437_v44 = vld [vmem:[#allocation2 + $0x2c8] sm:$0xff] }
  0x42   :  { %v1739_v38 = vpack.c.bf16 %v423_v35, %v415_v33  ;;  %v1709_v39 = vpack.c.bf16 %v420_v37, %v412_v36  ;;  %v1711_v46 = vpack.c.bf16 %v437_v44, %v429_v43  ;;  %v439_v47 = vld [vmem:[#allocation2 + $0x2d8] sm:$0xff]  ;;  %v428_v48 = vld [vmem:[#allocation2 + $0x280] sm:$0xff]  ;;  %v430_v52 = vld [vmem:[#allocation2 + $0x290] sm:$0xff]  ;;  %v2447_v36 = vsub.s32 2, %v2412_v18 }
  0x43   :  { %1670 = vmatpush3.bf16.msra.mxu0 %v1669_v56  ;;  %v381_v56 = vld [vmem:[#allocation2 + $0x108] sm:$0xff]  ;;  %v438_v53 = vld [vmem:[#allocation2 + $0x2d0] sm:$0xff]  ;;  %v452_v62 = vld [vmem:[#allocation2 + $0x340] sm:$0xff] }
  0x44   :  { %1672 = vmatprep.subr.bf16.mxu0 %v1671_v57  ;;  %v389_v57 = vld [vmem:[#allocation2 + $0x148] sm:$0xff]  ;;  %v1745_v55 = vpack.c.bf16 %v438_v53, %v430_v52  ;;  %v454_v1 = vld [vmem:[#allocation2 + $0x350] sm:$0xff]  ;;  %v352_v35 = vld [vmem:[#allocation2 + $0x20] sm:$0xff] }
  0x45   :  { %v1699_v59 = vpack.c.bf16 %v389_v57, %v381_v56  ;;  %v453_v56 = vld [vmem:[#allocation2 + $0x348] sm:$0xff]  ;;  %v447_v57 = vld [vmem:[#allocation2 + $0x318] sm:$0xff] }
  0x46   :  { %v461_v2 = vld [vmem:[#allocation2 + $0x388] sm:$0xff] }
  0x47   :  { %1674 = vmatpush3.bf16.msra.mxu0 %v1673_v60  ;;  %v383_v60 = vld [vmem:[#allocation2 + $0x118] sm:$0xff]  ;;  %v369_v44 = vld [vmem:[#allocation2 + $0xa8] sm:$0xff] }
  0x48   :  { %1724 = vmatprep.subr.bf16.mxu0 %v1723_v40  ;;  %v414_v40 = vld [vmem:[#allocation2 + $0x210] sm:$0xff] }
  0x4a   :  { %182 = vmatmul.mubr.f32.vlgmr.msra.gmra.mrb[0].mxu0 %v76_v61  ;;  %v391_v61 = vld [vmem:[#allocation2 + $0x158] sm:$0xff] }
  0x4b   :  { %622 = vmatprep.mubr.f32.mxu0 %v2153_v10  ;;  %1726 = vmatpush1.bf16.msra.mxu0 %v1725_v45  ;;  %v1731_v63 = vpack.c.bf16 %v391_v61, %v383_v60  ;;  %v431_v45 = vld [vmem:[#allocation2 + $0x298] sm:$0xff]  ;;  %v444_v61 = vld [vmem:[#allocation2 + $0x300] sm:$0xff] }
  0x4c   :  { %1728 = vmatprep.subr.bf16.mxu0 %v1727_v50  ;;  %v1743_v50 = vpack.c.bf16 %v439_v47, %v431_v45  ;;  %v1717_v0 = vpack.c.bf16 %v452_v62, %v444_v61  ;;  %v371_v47 = vld [vmem:[#allocation2 + $0xb8] sm:$0xff]  ;;  %v393_v61 = vld [vmem:[#allocation2 + $0x168] sm:$0xff] }
  0x4d   :  { %v387_v62 = vld [vmem:[#allocation2 + $0x138] sm:$0xff] }
  0x4f   :  { %1730 = vmatpush1.bf16.msra.mxu0 %v1729_v58  ;;  %v455_v58 = vld [vmem:[#allocation2 + $0x358] sm:$0xff] }
  0x50   :  { %1732 = vmatprep.subr.bf16.mxu0 %v1731_v63  ;;  %v1747_v60 = vpack.c.bf16 %v455_v58, %v447_v57  ;;  %v446_v63 = vld [vmem:[#allocation2 + $0x310] sm:$0xff] }
  0x53   :  { %1734 = vmatpush1.bf16.msra.mxu0 %v1733_v4  ;;  %v1749_v4 = vpack.c.bf16 %v454_v1, %v446_v63  ;;  %v395_v63 = vld [vmem:[#allocation2 + $0x178] sm:$0xff] }
 0x11d   :  { %v1536_v11 = vpop.f32.mrb[0].mxu0 }
 0x11e   :  { %v1537_v13 = vpop.f32.mrb[1].mxu0 }
 0x11f   :  { %v1538_v14 = vadd.f32 %v1537_v13, %v1536_v11 }
 0x121   :  { %v184_v15 = vadd.f32 %v1538_v14, %v1490_v12 }
 0x123   :  { %v187_v16 = vmax.f32 %v184_v15, 0.0 }
 0x125   :  { %1491 = vmatmul.mubr.msk.f32.vlgmr.msra.gmra.mrb[0].mxu1 %vm216_vm0, %v187_v16  ;;  %v397_v16 = vld [vmem:[#allocation2 + $0x188] sm:$0xff] }
 0x126   :  { %540 = vmatprep.mubr.f32.mxu1 %v2153_v10  ;;  %1694 = vmatpush1.bf16.msra.mxu1 %v1693_v41  ;;  %v422_v41 = vld [vmem:[#allocation2 + $0x250] sm:$0xff] }
 0x127   :  { %1696 = vmatprep.subr.bf16.mxu1 %v1695_v49  ;;  %v1741_v42 = vpack.c.bf16 %v422_v41, %v414_v40  ;;  %v436_v49 = vld [vmem:[#allocation2 + $0x2c0] sm:$0xff]  ;;  %v354_v40 = vld [vmem:[#allocation2 + $0x30] sm:$0xff] }
 0x128   :  { %v1713_v51 = vpack.c.bf16 %v436_v49, %v428_v48  ;;  %v362_v41 = vld [vmem:[#allocation2 + $0x70] sm:$0xff]  ;;  %v379_v48 = vld [vmem:[#allocation2 + $0xf8] sm:$0xff] }
 0x12a   :  { %1698 = vmatpush1.bf16.msra.mxu1 %v1697_v54  ;;  %v445_v54 = vld [vmem:[#allocation2 + $0x308] sm:$0xff] }
 0x12b   :  { %1700 = vmatprep.subr.bf16.mxu1 %v1699_v59  ;;  %v1715_v59 = vpack.c.bf16 %v453_v56, %v445_v54  ;;  %v378_v56 = vld [vmem:[#allocation2 + $0xf0] sm:$0xff] }
 0x12e   :  { %1702 = vmatpush1.bf16.msra.mxu1 %v1701_v3  ;;  %v469_v3 = vld [vmem:[#allocation2 + $0x3c8] sm:$0xff] }
 0x1f8   :  { %v286_v24 = vpop.f32.mrb[0].mxu1 }
 0x1f9   :  { %v287_v25 = vadd.f32 %v286_v24, %v209_v22  ;;  %v288_v26 = vpop.f32.mrb[1].mxu1  ;;  %v1703_v22 = vpack.c.bf16 %v405_v17, %v397_v16  ;;  %v396_v24 = vld [vmem:[#allocation2 + $0x180] sm:$0xff]  ;;  %v470_v16 = vld [vmem:[#allocation2 + $0x3d0] sm:$0xff]  ;;  %v353_v17 = vld [vmem:[#allocation2 + $0x28] sm:$0xff] }
 0x1fa   :  { %v289_v27 = vadd.f32 %v288_v26, %v213_v23  ;;  %v407_v23 = vld [vmem:[#allocation2 + $0x1d8] sm:$0xff] }
 0x1fb   :  { %v291_v28 = vmax.f32 %v287_v25, 0.0  ;;  %v404_v25 = vld [vmem:[#allocation2 + $0x1c0] sm:$0xff]  ;;  %v1735_v26 = vpack.c.bf16 %v407_v23, %v399_v20  ;;  %1704 = vmatprep.subr.bf16.mxu1 %v1703_v22  ;;  %v361_v20 = vld [vmem:[#allocation2 + $0x68] sm:$0xff]  ;;  %v355_v22 = vld [vmem:[#allocation2 + $0x38] sm:$0xff] }
 0x1fc   :  { %v292_v29 = vmax.f32 %v289_v27, 0.0  ;;  %v1705_v27 = vpack.c.bf16 %v404_v25, %v396_v24  ;;  %v363_v24 = vld [vmem:[#allocation2 + $0x78] sm:$0xff] }
 0x1fd   :  { %1736 = vmatprep.subr.bf16.mxu0 %v1735_v26  ;;  %v1755_v26 = vpack.c.bf16 %v361_v20, %v353_v17  ;;  %v411_v17 = vld [vmem:[#allocation2 + $0x1f8] sm:$0xff] }
 0x1fe   :  { %v293_v30 = vmax.f32 %v291_v28, %v292_v29  ;;  %1706 = vmatpush1.bf16.msra.mxu1 %v1705_v27  ;;  %v1787_v27 = vpack.c.bf16 %v363_v24, %v355_v22  ;;  %v408_v24 = vld [vmem:[#allocation2 + $0x1e0] sm:$0xff] }
 0x200   :  { %v294_v31 = vadd.f32 %v293_v30, %v291_v28 }
 0x202   :  { %v295_v32 = vadd.f32 %v294_v31, %v292_v29  ;;  %v413_v31 = vld [vmem:[#allocation2 + $0x208] sm:$0xff] }
 0x204   :  { %296 = vadd.xlane.f32.xlu0 %v295_v32  ;;  %v421_v32 = vld [vmem:[#allocation2 + $0x248] sm:$0xff] }
 0x205   :  { %v1707_v34 = vpack.c.bf16 %v421_v32, %v413_v31  ;;  %v313_v31 = vld [vmem:[%s2802_s5] sm:$0x7] }
 0x206   :  { %v2443_v32 = vld [vmem:[%s2803_s6] sm:$0x7]  ;;  %v319_v33 = vrot.slane %v313_v31, %v2415_v19  ;;  %v330_v43 = vrot.slane %v313_v31, %v2421_v21 }
 0x207   :  { %1708 = vmatprep.subr.bf16.mxu1 %v1707_v34  ;;  %v335_v54 = vrot.slane %v2443_v32, %v2421_v21 }
 0x208   :  { %1710 = vmatpush1.bf16.msra.mxu1 %v1709_v39  ;;  %v360_v39 = vld [vmem:[#allocation2 + $0x60] sm:$0xff] }
 0x209   :  { %1712 = vmatprep.subr.bf16.mxu1 %v1711_v46  ;;  %v377_v46 = vld [vmem:[#allocation2 + $0xe8] sm:$0xff]  ;;  %v1757_v49 = vpack.c.bf16 %v360_v39, %v352_v35 }
 0x20a   :  { %v1759_v58 = vpack.c.bf16 %v377_v46, %v369_v44  ;;  %v441_v44 = vld [vmem:[#allocation2 + $0x2e8] sm:$0xff]  ;;  %v443_v46 = vld [vmem:[#allocation2 + $0x2f8] sm:$0xff] }
 0x20c   :  { %1714 = vmatpush1.bf16.msra.mxu1 %v1713_v51  ;;  %v368_v51 = vld [vmem:[#allocation2 + $0xa0] sm:$0xff] }
 0x20d   :  { %1716 = vmatprep.subr.bf16.mxu1 %v1715_v59  ;;  %v1791_v59 = vpack.c.bf16 %v379_v48, %v371_v47 }
 0x210   :  { %1718 = vmatpush1.bf16.msra.mxu1 %v1717_v0 }
 0x291   :  { %v297_v5 = vpop.xlane.xlu0 %296 }
 0x292   :  { %v299_v6 = vmul.f32 0.0026041667, %v297_v5  ;;  %v1719_v5 = vpack.c.bf16 %v469_v3, %v461_v2  ;;  %v384_v2 = vld [vmem:[#allocation2 + $0x120] sm:$0xff] }
 0x293   :  { %v392_v3 = vld [vmem:[#allocation2 + $0x160] sm:$0xff] }
 0x294   :  { %v2425_v7 = vsub.f32 %v291_v28, %v299_v6  ;;  %v2427_v8 = vsub.f32 %v293_v30, %v299_v6  ;;  %v2429_v9 = vsub.f32 %v292_v29, %v299_v6  ;;  %v398_v28 = vld [vmem:[#allocation2 + $0x190] sm:$0xff]  ;;  %v463_v6 = vld [vmem:[#allocation2 + $0x398] sm:$0xff]  ;;  %1720 = vmatprep.subr.bf16.mxu1 %v1719_v5  ;;  %v346_v5 = vrot.slane %v2443_v32, %v2447_v36 }
 0x295   :  { %v406_v29 = vld [vmem:[#allocation2 + $0x1d0] sm:$0xff]  ;;  %v1765_v20 = vpack.c.bf16 %v392_v3, %v384_v2  ;;  %v465_v2 = vld [vmem:[#allocation2 + $0x3a8] sm:$0xff] }
 0x296   :  { %v301_v11 = vmul.f32 %v2425_v7, %v2425_v7  ;;  %v303_v12 = vmul.f32 %v2427_v8, %v2427_v8  ;;  %v306_v14 = vmul.f32 %v2429_v9, %v2429_v9  ;;  %v1737_v30 = vpack.c.bf16 %v406_v29, %v398_v28  ;;  %v473_v3 = vld [vmem:[#allocation2 + $0x3e8] sm:$0xff] }
 0x298   :  { %v304_v13 = vadd.f32 %v303_v12, %v301_v11  ;;  %1738 = vmatpush1.bf16.msra.mxu0 %v1737_v30  ;;  %v471_v11 = vld [vmem:[#allocation2 + $0x3d8] sm:$0xff]  ;;  %v460_v12 = vld [vmem:[#allocation2 + $0x380] sm:$0xff] }
 0x299   :  { %1740 = vmatprep.subr.bf16.mxu0 %v1739_v38  ;;  %v324_v38 = vrot.slane %v2443_v32, %v2415_v19  ;;  %v419_v32 = vld [vmem:[#allocation2 + $0x238] sm:$0xff] }
 0x29a   :  { %v307_v15 = vadd.f32 %v306_v14, %v304_v13  ;;  %v1751_v13 = vpack.c.bf16 %v471_v11, %v463_v6  ;;  %v468_v14 = vld [vmem:[#allocation2 + $0x3c0] sm:$0xff]  ;;  %v386_v6 = vld [vmem:[#allocation2 + $0x130] sm:$0xff] }
 0x29b   :  { %v1721_v23 = vpack.c.bf16 %v468_v14, %v460_v12  ;;  %v394_v11 = vld [vmem:[#allocation2 + $0x170] sm:$0xff]  ;;  %v401_v12 = vld [vmem:[#allocation2 + $0x1a8] sm:$0xff]  ;;  %v1795_v14 = vpack.c.bf16 %v395_v63, %v387_v62 }
 0x29c   :  { %308 = vadd.xlane.f32.xlu0 %v307_v15  ;;  %1742 = vmatpush1.bf16.msra.mxu0 %v1741_v42  ;;  %v462_v15 = vld [vmem:[#allocation2 + $0x390] sm:$0xff]  ;;  %v1797_v22 = vpack.c.bf16 %v394_v11, %v386_v6 }
 0x29d   :  { %1744 = vmatprep.subr.bf16.mxu0 %v1743_v50  ;;  %v1753_v25 = vpack.c.bf16 %v470_v16, %v462_v15  ;;  %1722 = vmatpush1.bf16.msra.mxu1 %v1721_v23  ;;  %v1789_v50 = vpack.c.bf16 %v362_v41, %v354_v40  ;;  %v409_v15 = vld [vmem:[#allocation2 + $0x1e8] sm:$0xff]  ;;  %v403_v16 = vld [vmem:[#allocation2 + $0x1b8] sm:$0xff]  ;;  %v400_v23 = vld [vmem:[#allocation2 + $0x1a0] sm:$0xff] }
 0x29e   :  { %1756 = vmatprep.subr.bf16.mxu1 %v1755_v26  ;;  %v1767_v26 = vpack.c.bf16 %v409_v15, %v401_v12  ;;  %v418_v41 = vld [vmem:[#allocation2 + $0x230] sm:$0xff]  ;;  %v464_v12 = vld [vmem:[#allocation2 + $0x3a0] sm:$0xff] }
 0x29f   :  { %v472_v15 = vld [vmem:[#allocation2 + $0x3e0] sm:$0xff] }
 0x2a0   :  { %1746 = vmatpush1.bf16.msra.mxu0 %v1745_v55  ;;  %v376_v55 = vld [vmem:[#allocation2 + $0xe0] sm:$0xff] }
 0x2a1   :  { %1748 = vmatprep.subr.bf16.mxu0 %v1747_v60  ;;  %v385_v60 = vld [vmem:[#allocation2 + $0x128] sm:$0xff]  ;;  %v1761_v0 = vpack.c.bf16 %v376_v55, %v368_v51 }
 0x2a2   :  { %v449_v55 = vld [vmem:[#allocation2 + $0x328] sm:$0xff] }
 0x2a4   :  { %1750 = vmatpush1.bf16.msra.mxu0 %v1749_v4 }
 0x2a5   :  { %1752 = vmatprep.subr.bf16.mxu0 %v1751_v13  ;;  %v1763_v13 = vpack.c.bf16 %v393_v61, %v385_v60  ;;  %v448_v60 = vld [vmem:[#allocation2 + $0x320] sm:$0xff] }
 0x2a6   :  { %v456_v61 = vld [vmem:[#allocation2 + $0x360] sm:$0xff] }
 0x2a7   :  { %v1781_v6 = vpack.c.bf16 %v456_v61, %v448_v60  ;;  %v829_v61 = vld [vmem:[#allocation5 + $0xf8] sm:$0xff] }
 0x2a8   :  { %1754 = vmatpush1.bf16.msra.mxu0 %v1753_v25 }
 0x2a9   :  { %1788 = vmatprep.subr.bf16.mxu0 %v1787_v27  ;;  %v1799_v27 = vpack.c.bf16 %v411_v17, %v403_v16  ;;  %v466_v16 = vld [vmem:[#allocation2 + $0x3b0] sm:$0xff] }
 0x2aa   :  { %v474_v17 = vld [vmem:[#allocation2 + $0x3f0] sm:$0xff] }
 0x329   :  { %v309_v28 = vpop.xlane.xlu0 %308 }
 0x32a   :  { %v310_v29 = vmul.f32 0.0026041667, %v309_v28  ;;  %v402_v28 = vld [vmem:[#allocation2 + $0x1b0] sm:$0xff] }
 0x32c   :  { %v311_v30 = vadd.f32 1e-05, %v310_v29  ;;  %v410_v29 = vld [vmem:[#allocation2 + $0x1f0] sm:$0xff] }
 0x32d   :  { %v1801_v35 = vpack.c.bf16 %v410_v29, %v402_v28  ;;  %v798_v28 = vld [vmem:[#allocation5] sm:$0xff] }
 0x32e   :  { %2013 = vrsqrt.f32 %v311_v30  ;;  %v417_v30 = vld [vmem:[#allocation2 + $0x228] sm:$0xff] }
 0x338   :  { %v2014_v34 = vpop.eup %2013 }
 0x339   :  { %v315_v37 = vmul.f32 %v2014_v34, %v2425_v7  ;;  %v326_v42 = vmul.f32 %v2014_v34, %v2427_v8  ;;  %v341_v7 = vrot.slane %v313_v31, %v2447_v36  ;;  %v370_v8 = vld [vmem:[#allocation2 + $0xb0] sm:$0xff]  ;;  %v337_v57 = vmul.f32 %v2014_v34, %v2429_v9  ;;  %v425_v31 = vld [vmem:[#allocation2 + $0x268] sm:$0xff] }
 0x33a   :  { %v1793_v1 = vpack.c.bf16 %v378_v56, %v370_v8  ;;  %v1769_v34 = vpack.c.bf16 %v408_v24, %v400_v23  ;;  %v1771_v39 = vpack.c.bf16 %v425_v31, %v417_v30  ;;  %v457_v8 = vld [vmem:[#allocation2 + $0x368] sm:$0xff]  ;;  %v451_v56 = vld [vmem:[#allocation2 + $0x338] sm:$0xff]  ;;  %v800_v31 = vld [vmem:[#allocation5 + $0x10] sm:$0xff] }
 0x33b   :  { %v320_v45 = vmul.f32 %v319_v33, %v315_v37  ;;  %v331_v53 = vmul.f32 %v330_v43, %v326_v42  ;;  %v342_v4 = vmul.f32 %v341_v7, %v337_v57  ;;  %v427_v33 = vld [vmem:[#allocation2 + $0x278] sm:$0xff]  ;;  %v416_v37 = vld [vmem:[#allocation2 + $0x220] sm:$0xff]  ;;  %v426_v42 = vld [vmem:[#allocation2 + $0x270] sm:$0xff]  ;;  %v1779_v62 = vpack.c.bf16 %v457_v8, %v449_v55 }
 0x33c   :  { %v1803_v40 = vpack.c.bf16 %v427_v33, %v419_v32  ;;  %v433_v43 = vld [vmem:[#allocation2 + $0x2a8] sm:$0xff]  ;;  %v1805_v48 = vpack.c.bf16 %v426_v42, %v418_v41  ;;  %v459_v57 = vld [vmem:[#allocation2 + $0x378] sm:$0xff]  ;;  %v804_v32 = vld [vmem:[#allocation5 + $0x30] sm:$0xff] }
 0x33d   :  { %v2455_v52 = vadd.f32 %v324_v38, %v320_v45  ;;  %v2464_v9 = vadd.f32 %v335_v54, %v331_v53  ;;  %v2472_v25 = vadd.f32 %v346_v5, %v342_v4  ;;  %v424_v38 = vld [vmem:[#allocation2 + $0x260] sm:$0xff]  ;;  %v435_v45 = vld [vmem:[#allocation2 + $0x2b8] sm:$0xff]  ;;  %v1775_v51 = vpack.c.bf16 %v441_v44, %v433_v43  ;;  %v434_v53 = vld [vmem:[#allocation2 + $0x2b0] sm:$0xff] }
 0x33e   :  { %v1773_v47 = vpack.c.bf16 %v424_v38, %v416_v37  ;;  %v1807_v7 = vpack.c.bf16 %v443_v46, %v435_v45  ;;  %v442_v54 = vld [vmem:[#allocation2 + $0x2f0] sm:$0xff]  ;;  %v1811_v63 = vpack.c.bf16 %v459_v57, %v451_v56  ;;  %v467_v4 = vld [vmem:[#allocation2 + $0x3b8] sm:$0xff]  ;;  %v803_v23 = vld [vmem:[#allocation5 + $0x28] sm:$0xff] }
 0x33f   :  { %541 = vmatmul.mubr.f32.vlgmr.msra.gmra.mrb[2].mxu1 %v2455_v52  ;;  %623 = vmatmul.mubr.f32.vlgmr.msra.gmra.mrb[2].mxu0 %v2455_v52  ;;  %v475_v5 = vld [vmem:[#allocation2 + $0x3f8] sm:$0xff]  ;;  %v807_v33 = vld [vmem:[#allocation5 + $0x48] sm:$0xff]  ;;  %v808_v43 = vld [vmem:[#allocation5 + $0x50] sm:$0xff] }
 0x340   :  { %1758 = vmatpush1.bf16.msra.mxu1 %v1757_v49  ;;  %1790 = vmatpush1.bf16.msra.mxu0 %v1789_v50  ;;  %v432_v49 = vld [vmem:[#allocation2 + $0x2a0] sm:$0xff]  ;;  %v801_v24 = vld [vmem:[#allocation5 + $0x18] sm:$0xff]  ;;  %v812_v44 = vld [vmem:[#allocation5 + $0x70] sm:$0xff] }
 0x341   :  { %545 = vmatprep.mubr.f32.mxu1 %v2153_v10  ;;  %628 = vmatprep.mubr.f32.mxu0 %v2153_v10  ;;  %v440_v50 = vld [vmem:[#allocation2 + $0x2e0] sm:$0xff]  ;;  %v813_v38 = vld [vmem:[#allocation5 + $0x78] sm:$0xff]  ;;  %v2509_v45 = vpack.c.bf16 %v812_v44, %v808_v43  ;;  %v815_v46 = vld [vmem:[#allocation5 + $0x88] sm:$0xff] }
 0x342   :  { %1760 = vmatprep.subr.bf16.mxu1 %v1759_v58  ;;  %1792 = vmatprep.subr.bf16.mxu0 %v1791_v59  ;;  %v1777_v58 = vpack.c.bf16 %v440_v50, %v432_v49  ;;  %v1809_v59 = vpack.c.bf16 %v442_v54, %v434_v53  ;;  %v821_v50 = vld [vmem:[#allocation5 + $0xb8] sm:$0xff]  ;;  %v816_v55 = vld [vmem:[#allocation5 + $0x90] sm:$0xff]  ;;  %v823_v57 = vld [vmem:[#allocation5 + $0xc8] sm:$0xff] }
 0x343   :  { %546 = vmatmul.mubr.f32.gmra.mrb[4].mxu1 %v2464_v9  ;;  %629 = vmatmul.mubr.f32.gmra.mrb[4].mxu0 %v2464_v9  ;;  %v820_v8 = vld [vmem:[#allocation5 + $0xb0] sm:$0xff]  ;;  %v851_v43 = vld [vmem:[#allocation5 + $0x1a8] sm:$0xff]  ;;  %v849_v44 = vld [vmem:[#allocation5 + $0x198] sm:$0xff] }
 0x344   :  { %1762 = vmatpush1.bf16.msra.mxu1 %v1761_v0  ;;  %1794 = vmatpush1.bf16.msra.mxu0 %v1793_v1  ;;  %v450_v0 = vld [vmem:[#allocation2 + $0x330] sm:$0xff]  ;;  %v2521_v56 = vpack.c.bf16 %v820_v8, %v816_v55 }
 0x345   :  { %551 = vmatprep.mubr.f32.mxu1 %v2153_v10  ;;  %634 = vmatprep.mubr.f32.mxu0 %v2153_v10  ;;  %v458_v1 = vld [vmem:[#allocation2 + $0x370] sm:$0xff] }
 0x346   :  { %1764 = vmatprep.subr.bf16.mxu1 %v1763_v13  ;;  %1796 = vmatprep.subr.bf16.mxu0 %v1795_v14  ;;  %v1813_v11 = vpack.c.bf16 %v458_v1, %v450_v0  ;;  %v1783_v13 = vpack.c.bf16 %v473_v3, %v465_v2  ;;  %v1815_v14 = vpack.c.bf16 %v475_v5, %v467_v4  ;;  %v824_v2 = vld [vmem:[#allocation5 + $0xd0] sm:$0xff]  ;;  %v831_v5 = vld [vmem:[#allocation5 + $0x108] sm:$0xff] }
 0x347   :  { %552 = vmatmul.mubr.f32.gmra.mrb[6].mxu1 %v2472_v25  ;;  %635 = vmatmul.mubr.f32.gmra.mrb[6].mxu0 %v2472_v25  ;;  %v828_v3 = vld [vmem:[#allocation5 + $0xf0] sm:$0xff] }
 0x348   :  { %1766 = vmatpush1.bf16.msra.mxu1 %v1765_v20  ;;  %1798 = vmatpush1.bf16.msra.mxu0 %v1797_v22  ;;  %v1785_v20 = vpack.c.bf16 %v472_v15, %v464_v12  ;;  %v1817_v22 = vpack.c.bf16 %v474_v17, %v466_v16  ;;  %v2533_v4 = vpack.c.bf16 %v828_v3, %v824_v2  ;;  %v834_v15 = vld [vmem:[#allocation5 + $0x120] sm:$0xff]  ;;  %v848_v55 = vld [vmem:[#allocation5 + $0x190] sm:$0xff] }
 0x349   :  { %1768 = vmatprep.subr.bf16.mxu1 %v1767_v26  ;;  %1800 = vmatprep.subr.bf16.mxu0 %v1799_v27  ;;  %v805_v27 = vld [vmem:[#allocation5 + $0x38] sm:$0xff]  ;;  %v852_v8 = vld [vmem:[#allocation5 + $0x1b0] sm:$0xff]  ;;  %v854_v2 = vld [vmem:[#allocation5 + $0x1c0] sm:$0xff] }
 0x34a   :  { %705 = vmatprep.mubr.f32.mxu1 %v2153_v10  ;;  %783 = vmatprep.mubr.f32.mxu0 %v2153_v10  ;;  %v2492_v29 = vpack.c.bf16 %v805_v27, %v801_v24  ;;  %v843_v24 = vld [vmem:[#allocation5 + $0x168] sm:$0xff]  ;;  %v841_v27 = vld [vmem:[#allocation5 + $0x158] sm:$0xff] }
 0x34c   :  { %1770 = vmatpush1.bf16.msra.mxu1 %v1769_v34  ;;  %1802 = vmatpush1.bf16.msra.mxu0 %v1801_v35  ;;  %v811_v34 = vld [vmem:[#allocation5 + $0x68] sm:$0xff]  ;;  %v809_v35 = vld [vmem:[#allocation5 + $0x58] sm:$0xff] }
 0x34d   :  { %1772 = vmatprep.subr.bf16.mxu1 %v1771_v39  ;;  %1804 = vmatprep.subr.bf16.mxu0 %v1803_v40  ;;  %v2502_v37 = vpack.c.bf16 %v811_v34, %v807_v33  ;;  %v806_v39 = vld [vmem:[#allocation5 + $0x40] sm:$0xff]  ;;  %v2504_v41 = vpack.c.bf16 %v813_v38, %v809_v35  ;;  %v840_v35 = vld [vmem:[#allocation5 + $0x150] sm:$0xff] }
 0x34e   :  { %v810_v40 = vld [vmem:[#allocation5 + $0x60] sm:$0xff]  ;;  %v844_v38 = vld [vmem:[#allocation5 + $0x170] sm:$0xff] }
 0x34f   :  { %v2506_v42 = vpack.c.bf16 %v810_v40, %v806_v39  ;;  %v2557_v39 = vpack.c.bf16 %v844_v38, %v840_v35  ;;  %v847_v40 = vld [vmem:[#allocation5 + $0x188] sm:$0xff] }
 0x350   :  { %1774 = vmatpush1.bf16.msra.mxu1 %v1773_v47  ;;  %1806 = vmatpush1.bf16.msra.mxu0 %v1805_v48  ;;  %v819_v47 = vld [vmem:[#allocation5 + $0xa8] sm:$0xff]  ;;  %v817_v48 = vld [vmem:[#allocation5 + $0x98] sm:$0xff] }
 0x351   :  { %1776 = vmatprep.subr.bf16.mxu1 %v1775_v51  ;;  %1808 = vmatprep.subr.bf16.mxu0 %v1807_v7  ;;  %v2514_v49 = vpack.c.bf16 %v819_v47, %v815_v46  ;;  %v814_v51 = vld [vmem:[#allocation5 + $0x80] sm:$0xff]  ;;  %v2516_v53 = vpack.c.bf16 %v821_v50, %v817_v48  ;;  %v2562_v46 = vpack.c.bf16 %v851_v43, %v847_v40  ;;  %v853_v47 = vld [vmem:[#allocation5 + $0x1b8] sm:$0xff] }
 0x352   :  { %v818_v7 = vld [vmem:[#allocation5 + $0xa0] sm:$0xff] }
 0x353   :  { %v2518_v54 = vpack.c.bf16 %v818_v7, %v814_v51  ;;  %v846_v48 = vld [vmem:[#allocation5 + $0x180] sm:$0xff]  ;;  %v2564_v51 = vpack.c.bf16 %v853_v47, %v849_v44 }
 0x354   :  { %1778 = vmatpush1.bf16.msra.mxu1 %v1777_v58  ;;  %1810 = vmatpush1.bf16.msra.mxu0 %v1809_v59  ;;  %v827_v58 = vld [vmem:[#allocation5 + $0xe8] sm:$0xff]  ;;  %v825_v59 = vld [vmem:[#allocation5 + $0xd8] sm:$0xff]  ;;  %v850_v50 = vld [vmem:[#allocation5 + $0x1a0] sm:$0xff] }
 0x355   :  { %1780 = vmatprep.subr.bf16.mxu1 %v1779_v62  ;;  %1812 = vmatprep.subr.bf16.mxu0 %v1811_v63  ;;  %v2526_v60 = vpack.c.bf16 %v827_v58, %v823_v57  ;;  %v822_v62 = vld [vmem:[#allocation5 + $0xc0] sm:$0xff]  ;;  %v2528_v0 = vpack.c.bf16 %v829_v61, %v825_v59  ;;  %v2566_v7 = vpack.c.bf16 %v850_v50, %v846_v48  ;;  %v855_v58 = vld [vmem:[#allocation5 + $0x1c8] sm:$0xff] }
 0x356   :  { %v826_v63 = vld [vmem:[#allocation5 + $0xe0] sm:$0xff]  ;;  %v2569_v57 = vpack.c.bf16 %v852_v8, %v848_v55  ;;  %v859_v59 = vld [vmem:[#allocation5 + $0x1e8] sm:$0xff] }
 0x357   :  { %v2530_v1 = vpack.c.bf16 %v826_v63, %v822_v62  ;;  %v2574_v61 = vpack.c.bf16 %v859_v59, %v855_v58  ;;  %v857_v62 = vld [vmem:[#allocation5 + $0x1d8] sm:$0xff] }
 0x358   :  { %1782 = vmatpush1.bf16.msra.mxu1 %v1781_v6  ;;  %1814 = vmatpush1.bf16.msra.mxu0 %v1813_v11  ;;  %v835_v6 = vld [vmem:[#allocation5 + $0x128] sm:$0xff]  ;;  %v833_v11 = vld [vmem:[#allocation5 + $0x118] sm:$0xff] }
 0x359   :  { %1784 = vmatprep.subr.bf16.mxu1 %v1783_v13  ;;  %1816 = vmatprep.subr.bf16.mxu0 %v1815_v14  ;;  %v2538_v12 = vpack.c.bf16 %v835_v6, %v831_v5  ;;  %v837_v13 = vld [vmem:[#allocation5 + $0x138] sm:$0xff]  ;;  %v830_v14 = vld [vmem:[#allocation5 + $0x100] sm:$0xff]  ;;  %v856_v6 = vld [vmem:[#allocation5 + $0x1d0] sm:$0xff] }
 0x35a   :  { %v2540_v16 = vpack.c.bf16 %v837_v13, %v833_v11  ;;  %v2542_v17 = vpack.c.bf16 %v834_v15, %v830_v14  ;;  %v861_v63 = vld [vmem:[#allocation5 + $0x1f8] sm:$0xff]  ;;  %v858_v5 = vld [vmem:[#allocation5 + $0x1e0] sm:$0xff]  ;;  %v860_v11 = vld [vmem:[#allocation5 + $0x1f0] sm:$0xff] }
 0x35b   :  { %v2576_v3 = vpack.c.bf16 %v861_v63, %v857_v62  ;;  %v2579_v13 = vpack.c.bf16 %v858_v5, %v854_v2  ;;  %v2581_v14 = vpack.c.bf16 %v860_v11, %v856_v6  ;;  %v2591_v15 = vld [vmem:[%s2806_s9] sm:$0xf] }
 0x35c   :  { %1786 = vmatpush1.bf16.msra.mxu1 %v1785_v20  ;;  %1818 = vmatpush1.bf16.msra.mxu0 %v1817_v22  ;;  %v832_v20 = vld [vmem:[#allocation5 + $0x110] sm:$0xff]  ;;  %v2605_v35 = vrot.slane %v2591_v15, %v2447_v36  ;;  %v1251_v63 = vld [vmem:[%s2807_s10] sm:$0xf] }
 0x35d   :  { %1852 = vmatprep.subr.bf16.mxu0 %v2492_v29  ;;  %v836_v22 = vld [vmem:[#allocation5 + $0x130] sm:$0xff] }
 0x35f   :  { %706 = vmatmul.mubr.f32.vlgmr.msra.gmra.mrb[8].mxu1 %v2455_v52  ;;  %784 = vmatmul.mubr.f32.vlgmr.msra.gmra.mrb[8].mxu0 %v2455_v52  ;;  %v799_v52 = vld [vmem:[#allocation5 + $0x8] sm:$0xff] }
 0x360   :  { %709 = vmatprep.mubr.f32.mxu1 %v2153_v10  ;;  %787 = vmatprep.mubr.f32.mxu0 %v2153_v10  ;;  %v2490_v26 = vpack.c.bf16 %v803_v23, %v799_v52  ;;  %v2545_v52 = vpack.c.bf16 %v836_v22, %v832_v20  ;;  %v839_v23 = vld [vmem:[#allocation5 + $0x148] sm:$0xff]  ;;  %v2595_v20 = vrot.slane %v2591_v15, %v2415_v19  ;;  %v878_v22 = vsub.s32 3, %v2412_v18 }
 0x362   :  { %1820 = vmatprep.subr.bf16.mxu1 %v2490_v26 }
 0x363   :  { %710 = vmatmul.mubr.f32.gmra.mrb[10].mxu1 %v2464_v9  ;;  %788 = vmatmul.mubr.f32.gmra.mrb[10].mxu0 %v2464_v9  ;;  %v802_v9 = vld [vmem:[#allocation5 + $0x20] sm:$0xff] }
 0x364   :  { %713 = vmatprep.mubr.f32.mxu1 %v2153_v10  ;;  %791 = vmatprep.mubr.f32.mxu0 %v2153_v10  ;;  %v2494_v30 = vpack.c.bf16 %v802_v9, %v798_v28  ;;  %v2550_v28 = vpack.c.bf16 %v843_v24, %v839_v23  ;;  %v845_v9 = vld [vmem:[#allocation5 + $0x178] sm:$0xff] }
 0x365   :  { %v2552_v33 = vpack.c.bf16 %v845_v9, %v841_v27 }
 0x366   :  { %1822 = vmatpush1.bf16.msra.mxu1 %v2494_v30 }
 0x367   :  { %714 = vmatmul.mubr.f32.gmra.mrb[12].mxu1 %v2472_v25  ;;  %792 = vmatmul.mubr.f32.gmra.mrb[12].mxu0 %v2472_v25  ;;  %v2497_v25 = vpack.c.bf16 %v804_v32, %v800_v31  ;;  %v838_v31 = vld [vmem:[#allocation5 + $0x140] sm:$0xff] }
 0x368   :  { %967 = vmatprep.mubr.f32.mxu1 %v2153_v10  ;;  %1038 = vmatprep.mubr.f32.mxu0 %v2153_v10  ;;  %v842_v32 = vld [vmem:[#allocation5 + $0x160] sm:$0xff] }
 0x369   :  { %1854 = vmatpush1.bf16.msra.mxu0 %v2497_v25  ;;  %1824 = vmatprep.subr.bf16.mxu1 %v2502_v37  ;;  %v2554_v34 = vpack.c.bf16 %v842_v32, %v838_v31 }
 0x36a   :  { %1856 = vmatprep.subr.bf16.mxu0 %v2504_v41  ;;  %1826 = vmatpush1.bf16.msra.mxu1 %v2506_v42 }
 0x36b   :  { %1828 = vmatprep.subr.bf16.mxu1 %v2514_v49 }
 0x36d   :  { %1858 = vmatpush1.bf16.msra.mxu0 %v2509_v45 }
 0x36e   :  { %1860 = vmatprep.subr.bf16.mxu0 %v2516_v53  ;;  %1830 = vmatpush1.bf16.msra.mxu1 %v2518_v54 }
 0x36f   :  { %1832 = vmatprep.subr.bf16.mxu1 %v2526_v60 }
 0x371   :  { %1862 = vmatpush1.bf16.msra.mxu0 %v2521_v56 }
 0x372   :  { %1864 = vmatprep.subr.bf16.mxu0 %v2528_v0  ;;  %1834 = vmatpush1.bf16.msra.mxu1 %v2530_v1 }
 0x373   :  { %1836 = vmatprep.subr.bf16.mxu1 %v2538_v12 }
 0x375   :  { %1866 = vmatpush1.bf16.msra.mxu0 %v2533_v4 }
 0x376   :  { %1868 = vmatprep.subr.bf16.mxu0 %v2540_v16  ;;  %1838 = vmatpush1.bf16.msra.mxu1 %v2542_v17 }
 0x377   :  { %1840 = vmatprep.subr.bf16.mxu1 %v2550_v28 }
 0x379   :  { %1870 = vmatpush1.bf16.msra.mxu0 %v2545_v52 }
 0x37a   :  { %1872 = vmatprep.subr.bf16.mxu0 %v2552_v33  ;;  %1842 = vmatpush1.bf16.msra.mxu1 %v2554_v34 }
 0x37b   :  { %1844 = vmatprep.subr.bf16.mxu1 %v2562_v46 }
 0x37d   :  { %1874 = vmatpush1.bf16.msra.mxu0 %v2557_v39 }
 0x37e   :  { %1876 = vmatprep.subr.bf16.mxu0 %v2564_v51  ;;  %1846 = vmatpush1.bf16.msra.mxu1 %v2566_v7 }
 0x37f   :  { %1848 = vmatprep.subr.bf16.mxu1 %v2574_v61 }
 0x381   :  { %1878 = vmatpush1.bf16.msra.mxu0 %v2569_v57 }
 0x382   :  { %1880 = vmatprep.subr.bf16.mxu0 %v2576_v3  ;;  %1850 = vmatpush1.bf16.msra.mxu1 %v2579_v13 }
 0x383   :  { %1884 = vmatprep.subr.bf16.mxu1 %v2490_v26  ;;  %v2600_v26 = vrot.slane %v2591_v15, %v878_v22 }
 0x385   :  { %1882 = vmatpush1.bf16.msra.mxu0 %v2581_v14 }
 0x386   :  { %1916 = vmatprep.subr.bf16.mxu0 %v2492_v29 }
 0x412   :  { %v542_v23 = vpop.f32.mrb[2].mxu1  ;;  %v624_v24 = vpop.f32.mrb[2].mxu0 }
 0x413   :  { %v884_v27 = vadd.f32 %v2595_v20, %v542_v23  ;;  %v544_v9 = vpop.f32.mrb[3].mxu1  ;;  %v626_v31 = vpop.f32.mrb[3].mxu0  ;;  %v885_v18 = vadd.f32 %v2605_v35, %v624_v24  ;;  %v1256_v23 = vrot.slane %v1251_v63, %v2415_v19  ;;  %v1264_v24 = vrot.slane %v1251_v63, %v878_v22 }
 0x414   :  { %v886_v32 = vadd.f32 %v2600_v26, %v626_v31  ;;  %v1260_v19 = vrot.slane %v1251_v63, %v2447_v36 }
 0x415   :  { %v1492_v29 = vmul.f32 -1.442695, %v884_v27 }
 0x416   :  { %v1493_v38 = vmul.f32 -1.442695, %v886_v32 }
 0x417   :  { %2015 = vpow2.f32 %v1492_v29 }
 0x418   :  { %2017 = vpow2.f32 %v1493_v38 }
 0x419   :  { %2019 = vtanh.f32 %v885_v18 }
 0x421   :  { %v2016_v40 = vpop.eup %2015 }
 0x422   :  { %v890_v43 = vadd.f32 1.0, %v2016_v40  ;;  %v2018_v44 = vpop.eup %2017 }
 0x423   :  { %v897_v47 = vadd.f32 1.0, %v2018_v44  ;;  %v2020_v48 = vpop.eup %2019 }
 0x424   :  { %2021 = vrcp.f32 %v890_v43 }
 0x425   :  { %2023 = vrcp.f32 %v897_v47 }
 0x42e   :  { %v2022_v50 = vpop.eup %2021 }
 0x42f   :  { %v2608_v55 = vmul.f32 %v2022_v50, %v2020_v48  ;;  %v2024_v27 = vpop.eup %2023 }
 0x431   :  { %2025 = vtanh.f32 %v2608_v55 }
 0x432   :  { %v707_v8 = vpop.f32.mrb[8].mxu1  ;;  %v785_v58 = vpop.f32.mrb[8].mxu0 }
 0x433   :  { %v708_v59 = vpop.f32.mrb[9].mxu1  ;;  %v786_v62 = vpop.f32.mrb[9].mxu0  ;;  %v1303_v8 = vld [vmem:[%s2809_s12] sm:$0xff]  ;;  %v1304_v58 = vld [vmem:[%s2809_s12 + $0x8] sm:$0xff] }
 0x434   :  { %v1948_v63 = vpack.c.bf16 %v1304_v58, %v1303_v8 }
 0x436   :  { %v711_v2 = vpop.f32.mrb[10].mxu1  ;;  %v789_v5 = vpop.f32.mrb[10].mxu0 }
 0x437   :  { %v712_v6 = vpop.f32.mrb[11].mxu1  ;;  %v790_v11 = vpop.f32.mrb[11].mxu0  ;;  %v1306_v5 = vld [vmem:[%s2809_s12 + $0x18] sm:$0xff] }
 0x438   :  { %v1307_v11 = vld [vmem:[%s2809_s12 + $0x20] sm:$0xff] }
 0x43a   :  { %v715_v9 = vpop.f32.mrb[12].mxu1  ;;  %v793_v31 = vpop.f32.mrb[12].mxu0 }
 0x43b   :  { %v2026_v29 = vpop.eup %2025  ;;  %v1268_v32 = vadd.f32 %v1256_v23, %v715_v9  ;;  %v717_v38 = vpop.f32.mrb[13].mxu1  ;;  %v1308_v23 = vld [vmem:[%s2809_s12 + $0x28] sm:$0xff]  ;;  %v1310_v9 = vld [vmem:[%s2809_s12 + $0x38] sm:$0xff] }
 0x43c   :  { %v795_v18 = vpop.f32.mrb[13].mxu0  ;;  %v902_v43 = vmul.f32 %v2026_v29, %v2024_v27  ;;  %v1309_v27 = vld [vmem:[%s2809_s12 + $0x30] sm:$0xff]  ;;  %v1312_v29 = vld [vmem:[%s2809_s12 + $0x48] sm:$0xff] }
 0x43d   :  { %v1270_v40 = vadd.f32 %v1264_v24, %v795_v18  ;;  %v1500_v44 = vmul.f32 -1.442695, %v1268_v32  ;;  %v1954_v24 = vpack.c.bf16 %v1308_v23, %v1307_v11  ;;  %v1313_v38 = vld [vmem:[%s2809_s12 + $0x50] sm:$0xff]  ;;  %v1314_v18 = vld [vmem:[%s2809_s12 + $0x58] sm:$0xff] }
 0x43e   :  { %968 = vmatmul.mubr.f32.vlgmr.msra.gmra.mrb[4].mxu1 %v902_v43  ;;  %1039 = vmatmul.mubr.f32.vlgmr.msra.gmra.mrb[4].mxu0 %v902_v43  ;;  %v1315_v43 = vld [vmem:[%s2809_s12 + $0x60] sm:$0xff] }
 0x43f   :  { %2027 = vpow2.f32 %v1500_v44  ;;  %1886 = vmatpush1.bf16.msra.mxu1 %v2494_v30  ;;  %1918 = vmatpush1.bf16.msra.mxu0 %v2497_v25  ;;  %v1501_v22 = vmul.f32 -1.442695, %v1270_v40  ;;  %v1269_v30 = vadd.f32 %v1260_v19, %v793_v31  ;;  %v1957_v31 = vpack.c.bf16 %v1310_v9, %v1309_v27  ;;  %v1316_v44 = vld [vmem:[%s2809_s12 + $0x68] sm:$0xff] }
 0x440   :  { %1888 = vmatprep.subr.bf16.mxu1 %v2502_v37  ;;  %1920 = vmatprep.subr.bf16.mxu0 %v2504_v41  ;;  %v1963_v40 = vpack.c.bf16 %v1314_v18, %v1313_v38  ;;  %v1966_v19 = vpack.c.bf16 %v1316_v44, %v1315_v43 }
 0x441   :  { %1141 = vmatprep.mubr.f32.mxu1 %v2153_v10  ;;  %1212 = vmatprep.mubr.f32.mxu0 %v2153_v10  ;;  %2029 = vpow2.f32 %v1501_v22  ;;  %v1317_v22 = vld [vmem:[%s2809_s12 + $0x70] sm:$0xff] }
 0x442   :  { %2031 = vtanh.f32 %v1269_v30  ;;  %v1318_v30 = vld [vmem:[%s2809_s12 + $0x78] sm:$0xff] }
 0x443   :  { %1890 = vmatpush1.bf16.msra.mxu1 %v2506_v42  ;;  %1922 = vmatpush1.bf16.msra.mxu0 %v2509_v45 }
 0x444   :  { %1892 = vmatprep.subr.bf16.mxu1 %v2514_v49  ;;  %1924 = vmatprep.subr.bf16.mxu0 %v2516_v53 }
 0x447   :  { %1894 = vmatpush1.bf16.msra.mxu1 %v2518_v54  ;;  %1926 = vmatpush1.bf16.msra.mxu0 %v2521_v56 }
 0x448   :  { %1896 = vmatprep.subr.bf16.mxu1 %v2526_v60  ;;  %1928 = vmatprep.subr.bf16.mxu0 %v2528_v0  ;;  %v2154_v60 = vmov 0.0|0.0   ;;  %v2654_v0 = vrot.slane %v2591_v15, %v2421_v21 }
 0x449   :  { %v2028_v36 = vpop.eup %2027 }
 0x44a   :  { %v1274_v25 = vadd.f32 1.0, %v2028_v36  ;;  %v1969_v36 = vpack.c.bf16 %v1318_v30, %v1317_v22 }
 0x44b   :  { %1898 = vmatpush1.bf16.msra.mxu1 %v2530_v1  ;;  %1930 = vmatpush1.bf16.msra.mxu0 %v2533_v4  ;;  %v2030_v37 = vpop.eup %2029 }
 0x44c   :  { %2033 = vrcp.f32 %v1274_v25  ;;  %1900 = vmatprep.subr.bf16.mxu1 %v2538_v12  ;;  %1932 = vmatprep.subr.bf16.mxu0 %v2540_v16  ;;  %v1281_v41 = vadd.f32 1.0, %v2030_v37  ;;  %v2032_v42 = vpop.eup %2031  ;;  %v1287_v25 = vld [vmem:[%s2808_s11] sm:$0xff]  ;;  %v1288_v37 = vld [vmem:[%s2808_s11 + $0x8] sm:$0xff] }
 0x44e   :  { %2035 = vrcp.f32 %v1281_v41  ;;  %v1972_v41 = vpack.c.bf16 %v1288_v37, %v1287_v25 }
 0x44f   :  { %1902 = vmatpush1.bf16.msra.mxu1 %v2542_v17  ;;  %1934 = vmatpush1.bf16.msra.mxu0 %v2545_v52 }
 0x450   :  { %1904 = vmatprep.subr.bf16.mxu1 %v2550_v28  ;;  %1936 = vmatprep.subr.bf16.mxu0 %v2552_v33 }
 0x453   :  { %1906 = vmatpush1.bf16.msra.mxu1 %v2554_v34  ;;  %1938 = vmatpush1.bf16.msra.mxu0 %v2557_v39 }
 0x454   :  { %1908 = vmatprep.subr.bf16.mxu1 %v2562_v46  ;;  %1940 = vmatprep.subr.bf16.mxu0 %v2564_v51 }
 0x456   :  { %v2034_v45 = vpop.eup %2033 }
 0x457   :  { %v1284_v49 = vmul.f32 %v2034_v45, %v2032_v42  ;;  %1910 = vmatpush1.bf16.msra.mxu1 %v2566_v7  ;;  %1942 = vmatpush1.bf16.msra.mxu0 %v2569_v57  ;;  %v1289_v42 = vld [vmem:[%s2808_s11 + $0x10] sm:$0xff]  ;;  %v1290_v45 = vld [vmem:[%s2808_s11 + $0x18] sm:$0xff] }
 0x458   :  { %1912 = vmatprep.subr.bf16.mxu1 %v2574_v61  ;;  %1944 = vmatprep.subr.bf16.mxu0 %v2576_v3  ;;  %v2036_v53 = vpop.eup %2035 }
 0x459   :  { %2037 = vtanh.f32 %v1284_v49  ;;  %v1975_v49 = vpack.c.bf16 %v1290_v45, %v1289_v42 }
 0x45b   :  { %1914 = vmatpush1.bf16.msra.mxu1 %v2579_v13  ;;  %1946 = vmatpush1.bf16.msra.mxu0 %v2581_v14 }
 0x45c   :  { %1947 = vmatprep.subr.bf16.mxu1 %v2154_v60  ;;  %1971 = vmatprep.subr.bf16.mxu0 %v2154_v60 }
 0x463   :  { %v2038_v54 = vpop.eup %2037 }
 0x464   :  { %v2648_v56 = vmul.f32 %v2038_v54, %v2036_v53  ;;  %v1291_v53 = vld [vmem:[%s2808_s11 + $0x20] sm:$0xff]  ;;  %v1292_v54 = vld [vmem:[%s2808_s11 + $0x28] sm:$0xff] }
 0x511   :  { %v969_v1 = vpop.f32.mrb[4].mxu1  ;;  %v1040_v4 = vpop.f32.mrb[4].mxu0 }
 0x512   :  { %v1049_v12 = vadd.f32 %v969_v1, %v2595_v20  ;;  %v971_v16 = vpop.f32.mrb[5].mxu1  ;;  %v1042_v17 = vpop.f32.mrb[5].mxu0  ;;  %v1051_v46 = vadd.f32 %v1040_v4, %v2605_v35  ;;  %v1293_v1 = vld [vmem:[%s2808_s11 + $0x30] sm:$0xff]  ;;  %v1294_v4 = vld [vmem:[%s2808_s11 + $0x38] sm:$0xff] }
 0x513   :  { %v1050_v52 = vadd.f32 %v971_v16, %v2654_v0  ;;  %v1052_v34 = vadd.f32 %v1042_v17, %v2600_v26  ;;  %v1295_v16 = vld [vmem:[%s2808_s11 + $0x40] sm:$0xff]  ;;  %v1296_v17 = vld [vmem:[%s2808_s11 + $0x48] sm:$0xff] }
 0x514   :  { %v1494_v28 = vmul.f32 -1.442695, %v1049_v12  ;;  %v1981_v12 = vpack.c.bf16 %v1294_v4, %v1293_v1 }
 0x515   :  { %v1495_v33 = vmul.f32 -1.442695, %v1050_v52  ;;  %v1496_v39 = vmul.f32 -1.442695, %v1052_v34  ;;  %v1984_v52 = vpack.c.bf16 %v1296_v17, %v1295_v16  ;;  %v1299_v34 = vld [vmem:[%s2808_s11 + $0x60] sm:$0xff] }
 0x516   :  { %2039 = vpow2.f32 %v1494_v28  ;;  %v1297_v28 = vld [vmem:[%s2808_s11 + $0x50] sm:$0xff] }
 0x517   :  { %2041 = vpow2.f32 %v1495_v33  ;;  %v1298_v33 = vld [vmem:[%s2808_s11 + $0x58] sm:$0xff] }
 0x518   :  { %2043 = vpow2.f32 %v1496_v39  ;;  %v1987_v39 = vpack.c.bf16 %v1298_v33, %v1297_v28 }
 0x519   :  { %2045 = vtanh.f32 %v1051_v46  ;;  %v1300_v46 = vld [vmem:[%s2808_s11 + $0x68] sm:$0xff] }
 0x520   :  { %v2040_v51 = vpop.eup %2039 }
 0x521   :  { %v2042_v21 = vpop.eup %2041  ;;  %v1056_v7 = vadd.f32 1.0, %v2040_v51  ;;  %v1990_v51 = vpack.c.bf16 %v1300_v46, %v1299_v34 }
 0x522   :  { %v1062_v57 = vadd.f32 1.0, %v2042_v21  ;;  %v2044_v61 = vpop.eup %2043  ;;  %v1301_v21 = vld [vmem:[%s2808_s11 + $0x70] sm:$0xff] }
 0x523   :  { %2047 = vrcp.f32 %v1056_v7  ;;  %v2046_v3 = vpop.eup %2045  ;;  %v1069_v47 = vadd.f32 1.0, %v2044_v61  ;;  %v1302_v7 = vld [vmem:[%s2808_s11 + $0x78] sm:$0xff] }
 0x524   :  { %2049 = vrcp.f32 %v1062_v57  ;;  %v1993_v57 = vpack.c.bf16 %v1302_v7, %v1301_v21 }
 0x525   :  { %2051 = vrcp.f32 %v1069_v47 }
 0x52d   :  { %v2048_v13 = vpop.eup %2047 }
 0x52e   :  { %v2050_v14 = vpop.eup %2049  ;;  %v1073_v15 = vmul.f32 %v2048_v13, %v2046_v3 }
 0x52f   :  { %v1072_v48 = vmul.f32 %v2050_v14, %v2608_v55  ;;  %v2052_v59 = vpop.eup %2051  ;;  %v1305_v55 = vld [vmem:[%s2809_s12 + $0x10] sm:$0xff] }
 0x530   :  { %v1951_v6 = vpack.c.bf16 %v1306_v5, %v1305_v55 }
 0x531   :  { %v2661_v50 = vadd.f32 %v1073_v15, %v1072_v48 }
 0x533   :  { %2053 = vtanh.f32 %v2661_v50 }
 0x53d   :  { %v2054_v62 = vpop.eup %2053 }
 0x53e   :  { %v1076_v2 = vmul.f32 %v2054_v62, %v2052_v59 }
 0x540   :  { %1142 = vmatmul.mubr.f32.vlgmr.msra.gmra.mrb[6].mxu1 %v1076_v2  ;;  %1213 = vmatmul.mubr.f32.vlgmr.msra.gmra.mrb[6].mxu0 %v1076_v2 }
 0x541   :  { %1949 = vmatpush3.bf16.msra.mxu1 %v1948_v63  ;;  %1605 = vmatprep.mubr.msk.f32.mxu1 %vm2155_vm1, %v2153_v10 }
 0x542   :  { %1950 = vmatprep.subr.bf16.mxu1 %v2154_v60  ;;  %1640 = vmatprep.mubr.msk.f32.mxu0 %vm2155_vm1, %v2153_v10  ;;  %v1311_v10 = vld [vmem:[%s2809_s12 + $0x40] sm:$0xff] }
 0x543   :  { %v1960_v32 = vpack.c.bf16 %v1312_v29, %v1311_v10  ;;  %1973 = vmatpush3.bf16.msra.mxu0 %v1972_v41 }
 0x544   :  { %1974 = vmatprep.subr.bf16.mxu0 %v2154_v60 }
 0x545   :  { %1952 = vmatpush3.bf16.msra.mxu1 %v1951_v6 }
 0x546   :  { %1953 = vmatprep.subr.bf16.mxu1 %v2154_v60 }
 0x547   :  { %1976 = vmatpush3.bf16.msra.mxu0 %v1975_v49 }
 0x548   :  { %1977 = vmatprep.subr.bf16.mxu0 %v2154_v60 }
 0x549   :  { %1955 = vmatpush3.bf16.msra.mxu1 %v1954_v24 }
 0x54a   :  { %1956 = vmatprep.subr.bf16.mxu1 %v2154_v60 }
 0x54d   :  { %1958 = vmatpush3.bf16.msra.mxu1 %v1957_v31 }
 0x54e   :  { %1959 = vmatprep.subr.bf16.mxu1 %v2154_v60 }
 0x551   :  { %1961 = vmatpush3.bf16.msra.mxu1 %v1960_v32  ;;  %v1502_v32 = vld [vmem:[%s2810_s13] ss:$0 sm:$0xff] }
 0x552   :  { %1962 = vmatprep.subr.bf16.mxu1 %v2154_v60 }
 0x555   :  { %1964 = vmatpush3.bf16.msra.mxu1 %v1963_v40 }
 0x556   :  { %1965 = vmatprep.subr.bf16.mxu1 %v2154_v60 }
 0x559   :  { %1967 = vmatpush3.bf16.msra.mxu1 %v1966_v19 }
 0x55a   :  { %1968 = vmatprep.subr.bf16.mxu1 %v2154_v60 }
 0x55d   :  { %1970 = vmatpush3.bf16.msra.mxu1 %v1969_v36 }
 0x560   :  { %1606 = vmatmul.mubr.f32.vlgmr.msra.gmra.mrb[14].mxu1 %v2648_v56  ;;  %v1978_v56 = vpack.c.bf16 %v1292_v54, %v1291_v53 }
 0x562   :  { %1979 = vmatpush3.bf16.msra.mxu0 %v1978_v56 }
 0x563   :  { %1980 = vmatprep.subr.bf16.mxu0 %v2154_v60 }
 0x566   :  { %1982 = vmatpush3.bf16.msra.mxu0 %v1981_v12 }
 0x567   :  { %1983 = vmatprep.subr.bf16.mxu0 %v2154_v60 }
 0x56a   :  { %1985 = vmatpush3.bf16.msra.mxu0 %v1984_v52 }
 0x56b   :  { %1986 = vmatprep.subr.bf16.mxu0 %v2154_v60 }
 0x56e   :  { %1988 = vmatpush3.bf16.msra.mxu0 %v1987_v39 }
 0x56f   :  { %1989 = vmatprep.subr.bf16.mxu0 %v2154_v60 }
 0x572   :  { %1991 = vmatpush3.bf16.msra.mxu0 %v1990_v51 }
 0x573   :  { %1992 = vmatprep.subr.bf16.mxu0 %v2154_v60 }
 0x576   :  { %1994 = vmatpush3.bf16.msra.mxu0 %v1993_v57 }
 0x613   :  { %v1143_v61 = vpop.f32.mrb[6].mxu1  ;;  %v1214_v3 = vpop.f32.mrb[6].mxu0 }
 0x614   :  { %v1223_v13 = vadd.f32 %v1143_v61, %v2595_v20  ;;  %v1145_v14 = vpop.f32.mrb[7].mxu1  ;;  %v1216_v15 = vpop.f32.mrb[7].mxu0  ;;  %v1225_v62 = vadd.f32 %v1214_v3, %v2605_v35 }
 0x615   :  { %v1224_v47 = vadd.f32 %v1145_v14, %v2654_v0  ;;  %v1226_v58 = vadd.f32 %v1216_v15, %v2600_v26 }
 0x616   :  { %v1497_v48 = vmul.f32 -1.442695, %v1223_v13 }
 0x617   :  { %v1498_v8 = vmul.f32 -1.442695, %v1224_v47  ;;  %v1499_v59 = vmul.f32 -1.442695, %v1226_v58 }
 0x618   :  { %2055 = vpow2.f32 %v1497_v48 }
 0x619   :  { %2057 = vpow2.f32 %v1498_v8 }
 0x61a   :  { %2059 = vpow2.f32 %v1499_v59 }
 0x61b   :  { %2061 = vtanh.f32 %v1225_v62 }
 0x622   :  { %v2056_v63 = vpop.eup %2055 }
 0x623   :  { %v2058_v60 = vpop.eup %2057  ;;  %v1230_v2 = vadd.f32 1.0, %v2056_v63 }
 0x624   :  { %v1236_v55 = vadd.f32 1.0, %v2058_v60  ;;  %v2060_v20 = vpop.eup %2059 }
 0x625   :  { %2063 = vrcp.f32 %v1230_v2  ;;  %v2062_v5 = vpop.eup %2061  ;;  %v1243_v23 = vadd.f32 1.0, %v2060_v20 }
 0x626   :  { %2065 = vrcp.f32 %v1236_v55 }
 0x627   :  { %2067 = vrcp.f32 %v1243_v23 }
 0x62f   :  { %v2064_v0 = vpop.eup %2063 }
 0x630   :  { %v2066_v6 = vpop.eup %2065  ;;  %v1247_v11 = vmul.f32 %v2064_v0, %v2062_v5 }
 0x631   :  { %v1246_v24 = vmul.f32 %v2066_v6, %v2661_v50  ;;  %v2068_v9 = vpop.eup %2067 }
 0x633   :  { %v1248_v26 = vadd.f32 %v1247_v11, %v1246_v24  ;;  %v1385_v27 = vpop.f32.mrb[14].mxu1 }
 0x634   :  { %v1607_v35 = vpop.f32.mrb[15].mxu1 }
 0x635   :  { %2069 = vtanh.f32 %v1248_v26 }
 0x63f   :  { %v2070_v31 = vpop.eup %2069 }
 0x640   :  { %v1250_v10 = vmul.f32 %v2070_v31, %v2068_v9 }
 0x642   :  { %1641 = vmatmul.mubr.f32.vlgmr.msra.gmra.mrb[14].mxu0 %v1250_v10 }
 0x715   :  { %v1455_v29 = vpop.f32.mrb[14].mxu0 }
 0x716   :  { %v1456_v38 = vadd.f32 %v1455_v29, %v1385_v27  ;;  %v1642_v18 = vpop.f32.mrb[15].mxu0 }
 0x718   :  { %v1466_v40 = vadd.f32 %v1502_v32, %v1456_v38 }
 0x71a   :  { %v1503_v43 = vmul.f32 -1.442695, %v1466_v40 }
 0x71c   :  { %2071 = vpow2.f32 %v1503_v43 }
 0x726   :  { %v2072_v50 = vpop.eup %2071 }
 0x727   :  { %v1470_v44 = vadd.f32 1.0, %v2072_v50 }
 0x729   :  { %2073 = vrcp.f32 %v1470_v44 }
 0x733   :  { %v2074_v19 = vpop.eup %2073 }
 0x734   :  { %1473 = vst [vmem:[#allocation7] sm:$0xff] %v2074_v19 }
 0x735   :  { %2130 = shalt.err (!%p2127_p6)
}
 0x736   :  { %s2131_s16 = scalar_lea.hbm %s2811_s14, 128 }
 0x737   :  { %p2132_p7 = scmp.ne.s32.totalorder %s2811_s14, %s2131_s16  ;;  %p2135_p8 = scmp.lt.u32.totalorder %s2131_s16, %s2811_s14 }
 0x739   :  { %p2137_p9 = pnand %p2135_p8, %p2132_p7 }
 0x73b   :  { %2140 = shalt.err (!%p2137_p9)
}
 0x73c   :  { %1483 = dma.vmem_to_hbm [thread:$0]  %s1481_s27, 128, %s2811_s14, [#allocation4]  }
 0x73d   :  { %2145 = dma.done.wait [#allocation4], 128  }
 0x73e   :  { %2146 = vsyncadd [#allocation4], 4294967168 }
 0x73f   :  { %1487 = vsyncpa [#allocation3], 1 }
 0x740   :  { %1488 = vsyncpa [#allocation6], 1 }
 0x741   :  { %1489 = vsyncpa [#allocation4], 1 }

</bundles_post_ra>
